<compile_context>
chip_gen: v6e
topology: v6e:2x2x1
jax: 0.10.0
libtpu: 0.0.40
codegen_flags: <defaults>
</compile_context>

<pallas_src>
from functools import partial

import numpy as np
import jax
import jax.numpy as jnp
from jax import lax
from jax.experimental import pallas as pl
from jax.experimental.pallas import tpu as pltpu


# ------------------------------ kernel ------------------------------------- #
def residual_block_kernel(x_ref, t_ref, w1s_ref, w2_ref, b1_ref, b2_ref,
                          out_ref, *, img_h):
    """One block of Nb images as a lane-dense (Nb*H, W*C) slab per grid step."""
    rows, wco = out_ref.shape                       # rows = Nb*H, wco = W*Cout

    def silu(v):
        return v * jax.nn.sigmoid(v)

    # Per-image height-halo masks: row 0 / row H-1 of each image read zero pad.
    r = lax.broadcasted_iota(jnp.int32, (rows, 1), 0) % img_h
    not_first = r != 0
    not_last = r != (img_h - 1)

    def combine_taps(y):
        # y[:, :3*wco] = [top | mid | bot] per-kh tap results (f32).
        # out[h] = top[h-1] + mid[h] + bot[h+1]; shift rows with the XLU
        # (pltpu.roll) and zero the per-image halo rows.  roll wraps across
        # image boundaries but those rows are exactly the masked ones.
        top = jnp.where(not_first, pltpu.roll(y[:, 0 * wco:1 * wco], 1, 0), 0.0)
        mid = y[:, 1 * wco:2 * wco]
        bot = jnp.where(not_last,
                        pltpu.roll(y[:, 2 * wco:3 * wco], rows - 1, 0), 0.0)
        return top + mid + bot

    x = x_ref[...]                                                # (rows, W*Cin) bf16

    # conv1 (3 kh taps) + skip 1x1 share the same LHS -> one fused MXU matmul.
    y1 = jnp.dot(x, w1s_ref[...],
                 preferred_element_type=jnp.float32)              # (rows, 4*wco)
    h = silu(combine_taps(y1) + b1_ref[...])                      # conv1 + bias, SiLU
    h = silu(h + t_ref[...])                                      # + time proj, SiLU

    # conv2 (3 kh taps) as one MXU matmul.
    y2 = jnp.dot(h.astype(w2_ref.dtype), w2_ref[...],
                 preferred_element_type=jnp.float32)              # (rows, 3*wco)
    out = combine_taps(y2) + y1[:, 3 * wco:] + b2_ref[...]        # + skip + (b2+bs)
    out_ref[...] = out.astype(out_ref.dtype)                      # (rows, W*Cout)


# --------------------------- weight transforms ------------------------------ #
def conv_tap_matrices(w, W):
    """(3,3,Cin,Cout) HWIO conv weights -> (W*Cin, 3*W*Cout) matrix.

    Column block i (of width W*Cout) is the width-banded matrix for kh tap i:
      (x_row[h] @ block_i)[wo*Cout+co] = sum_{kw,ci} x[h, wo+kw-1, ci]*w[i,kw,ci,co]
    with width zero-padding encoded as dropped (zero) bands.  The height shift
    (rows h-1 / h / h+1) is applied in-kernel with pltpu.roll.
    O(W^2*Cin*Cout) storage: fine at demo sizes; at real channel counts switch
    to plain im2col (see header note).
    """
    _, _, Cin, Cout = w.shape
    # S[kw, wi, wo] = 1 iff wi == wo + kw - 1 (tap kw reads input col wi for output col wo)
    S = np.stack([np.eye(W, k=1 - j, dtype=np.float32) for j in range(3)])
    M = jnp.einsum("kab,ikcd->acibd", jnp.asarray(S), w.astype(jnp.float32))
    return M.reshape(W * Cin, 3 * W * Cout)


def skip_block_diag(ws, W):
    """(Cin, Cout) 1x1 conv weights -> block-diagonal (W*Cin, W*Cout) matrix."""
    Cin, Cout = ws.shape
    return jnp.einsum("ab,cd->acbd", jnp.eye(W, dtype=jnp.float32),
                      ws.astype(jnp.float32)).reshape(W * Cin, W * Cout)


def _pick_block_batch(N, H, target_rows=256):
    """Images per grid step: feed the MXU (>=128/256 rows) but keep >=2 steps."""
    nb = max(1, min(N, max(1, target_rows // H)))
    while N % nb:
        nb -= 1
    if N >= 2 and N // nb < 2:        # v7x: keep both TensorCores busy
        nb = max(1, nb // 2)
        while N % nb:
            nb -= 1
    return nb


# ------------------------------ wrapper ------------------------------------- #
def residual_block(x_nchw, t_emb, params):
    """PyTorch convention: NCHW in / NCHW out."""
    N, Cin, H, W = x_nchw.shape
    Cout = params["w1"].shape[-1]
    WCi, WCo = W * Cin, W * Cout

    nb = _pick_block_batch(N, H)
    rows = nb * H

    # TODO(synk): keep activations lane-dense (N*H, W*C) across the whole model
    # so this per-block NCHW <-> lane-dense transpose (an extra HBM round trip
    # per block) disappears.
    x_rows = jnp.transpose(x_nchw, (0, 2, 3, 1)).reshape(N * H, WCi)
    x_rows = x_rows.astype(jnp.bfloat16)

    # One-time weight transforms (wrapper side, plain XLA); bf16 for the MXU.
    w1taps = conv_tap_matrices(params["w1"], W)                  # (W*Cin, 3*W*Cout)
    wskip = skip_block_diag(params["ws"], W)                     # (W*Cin,   W*Cout)
    w1s = jnp.concatenate([w1taps, wskip], axis=1).astype(jnp.bfloat16)  # (WCi, 4*WCo)
    w2 = conv_tap_matrices(params["w2"], W).astype(jnp.bfloat16)         # (WCo, 3*WCo)
    b1_row = jnp.tile(params["b1"].reshape(1, Cout), (1, W)).astype(jnp.float32)
    b2_row = jnp.tile((params["b2"] + params["bs"]).reshape(1, Cout),
                      (1, W)).astype(jnp.float32)

    # Hoisted time projection: one XLA matmul over the whole batch, then
    # broadcast to per-row form (kernel stays purely 2-D, no in-kernel reshape).
    tproj = t_emb.astype(jnp.float32) @ params["wt"] + params["bt"]      # (N, Cout)
    tproj_rows = jnp.broadcast_to(jnp.tile(tproj, (1, W))[:, None, :],
                                  (N, H, WCo)).reshape(N * H, WCo)

    kernel = partial(residual_block_kernel, img_h=H)

    out_rows = pl.pallas_call(
        kernel,
        out_shape=jax.ShapeDtypeStruct((N * H, WCo), x_nchw.dtype),
        grid_spec=pltpu.PrefetchScalarGridSpec(
            num_scalar_prefetch=0,
            grid=(N // nb,),
            in_specs=[
                pl.BlockSpec((rows, WCi), lambda n: (n, 0)),        # x rows (bf16)
                pl.BlockSpec((rows, WCo), lambda n: (n, 0)),        # time-proj rows
                pl.BlockSpec((WCi, 4 * WCo), lambda n: (0, 0)),     # conv1 taps + skip
                pl.BlockSpec((WCo, 3 * WCo), lambda n: (0, 0)),     # conv2 taps
                pl.BlockSpec((1, WCo), lambda n: (0, 0)),           # b1 row
                pl.BlockSpec((1, WCo), lambda n: (0, 0)),           # b2 + bs row
            ],
            out_specs=pl.BlockSpec((rows, WCo), lambda n: (n, 0)),
        ),
        compiler_params=pltpu.CompilerParams(
            dimension_semantics=("parallel",)),
    )(x_rows, tproj_rows, w1s, w2, b1_row, b2_row)

    # (N*H, W*Cout) -> (N, Cout, H, W)
    return jnp.transpose(out_rows.reshape(N, H, W, Cout), (0, 3, 1, 2))


# ------------------------------ reference ----------------------------------- #
def reference_residual_block(x_nchw, t_emb, params):
    """Pure-JAX reference (matches the PyTorch forward), f32 / HIGHEST."""
    dn = ("NHWC", "HWIO", "NHWC")
    prec = lax.Precision.HIGHEST
    x = jnp.transpose(x_nchw, (0, 2, 3, 1)).astype(jnp.float32)

    def silu(v):
        return v * jax.nn.sigmoid(v)

    h = lax.conv_general_dilated(x, params["w1"], (1, 1), "SAME",
                                 dimension_numbers=dn, precision=prec) + params["b1"]
    h = silu(h)
    tproj = t_emb.astype(jnp.float32) @ params["wt"] + params["bt"]   # (N, Cout)
    h = silu(h + tproj[:, None, None, :])
    h = lax.conv_general_dilated(h, params["w2"], (1, 1), "SAME",
                                 dimension_numbers=dn, precision=prec) + params["b2"]
    skip = lax.conv_general_dilated(x, params["ws"][None, None], (1, 1), "SAME",
                                    dimension_numbers=dn, precision=prec) + params["bs"]
    return jnp.transpose(h + skip, (0, 3, 1, 2))


if __name__ == "__main__":
    # N chosen so each grid step carries nb=8 images -> M = 128 matmul rows,
    # with 2 grid steps ("parallel") for v7x's two TensorCores.
    N, Cin, Cout, H, W, T = 16, 4, 8, 16, 16, 32

    key = jax.random.PRNGKey(0)
    ks = jax.random.split(key, 12)

    params = {
        "w1": 0.1 * jax.random.normal(ks[0], (3, 3, Cin, Cout), jnp.float32),
        "b1": 0.1 * jax.random.normal(ks[1], (1, Cout), jnp.float32),
        "w2": 0.1 * jax.random.normal(ks[2], (3, 3, Cout, Cout), jnp.float32),
        "b2": 0.1 * jax.random.normal(ks[3], (1, Cout), jnp.float32),
        "wt": 0.1 * jax.random.normal(ks[4], (T, Cout), jnp.float32),
        "bt": 0.1 * jax.random.normal(ks[5], (1, Cout), jnp.float32),
        "ws": 0.1 * jax.random.normal(ks[6], (Cin, Cout), jnp.float32),
        "bs": 0.1 * jax.random.normal(ks[7], (1, Cout), jnp.float32),
    }

    x = jax.random.normal(ks[8], (N, Cin, H, W), jnp.float32)
    t_emb = jax.random.normal(ks[9], (N, T), jnp.float32)

    out = jax.block_until_ready(residual_block(x, t_emb, params))
    ref = jax.block_until_ready(reference_residual_block(x, t_emb, params))

    assert out.shape == (N, Cout, H, W), out.shape
    err = float(jnp.max(jnp.abs(out - ref)))
    # bf16 MXU operands with f32 accumulation: tolerance relaxed from the f32
    # path's 2e-4 (expected max abs error ~1e-2 at these magnitudes).
    assert err < 5e-2, f"max abs error {err}"

    print("KERNEL_OK")
</pallas_src>

<mosaic_0001>
module attributes {stable_mosaic.version = 11 : i64} {
  func.func @residual_block_kernel(%arg0: i32, %arg1: memref<128x64xbf16, #tpu.memory_space<vmem>>, %arg2: memref<128x128xf32, #tpu.memory_space<vmem>>, %arg3: memref<64x512xbf16, #tpu.memory_space<vmem>>, %arg4: memref<128x384xbf16, #tpu.memory_space<vmem>>, %arg5: memref<1x128xf32, #tpu.memory_space<vmem>>, %arg6: memref<1x128xf32, #tpu.memory_space<vmem>>, %arg7: memref<128x128xf32, #tpu.memory_space<vmem>>) attributes {dimension_semantics = [#tpu.dimension_semantics<parallel>], iteration_bounds = array<i64: 2>, scalar_prefetch = 0 : i64, scratch_operands = 0 : i64, tpu.core_type = #tpu.core_type<tc>, window_params = [{transform_indices = @transform_0, window_bounds = array<i64: 128, 64>}, {transform_indices = @transform_1, window_bounds = array<i64: 128, 128>}, {pipeline_mode = #tpu.pipeline_mode<synchronous>, transform_indices = @transform_2, window_bounds = array<i64: 64, 512>}, {pipeline_mode = #tpu.pipeline_mode<synchronous>, transform_indices = @transform_3, window_bounds = array<i64: 128, 384>}, {pipeline_mode = #tpu.pipeline_mode<synchronous>, transform_indices = @transform_4, window_bounds = array<i64: 1, 128>}, {pipeline_mode = #tpu.pipeline_mode<synchronous>, transform_indices = @transform_5, window_bounds = array<i64: 1, 128>}, {transform_indices = @transform_6, window_bounds = array<i64: 128, 128>}]} {
    %0 = tpu.iota {dimensions = array<i32: 0>} : vector<128x1xi32>
    %c16_i32 = arith.constant 16 : i32
    %c0_i32 = arith.constant 0 : i32
    %1 = arith.cmpi eq, %c16_i32, %c0_i32 : i32
    %c1_i32 = arith.constant 1 : i32
    %2 = arith.select %1, %c1_i32, %c16_i32 : i32
    %3 = vector.broadcast %2 : i32 to vector<128x1xi32>
    %4 = arith.remsi %0, %3 : vector<128x1xi32>
    %c0_i32_0 = arith.constant 0 : i32
    %5 = vector.broadcast %c0_i32_0 : i32 to vector<128x1xi32>
    %6 = arith.cmpi ne, %4, %5 : vector<128x1xi32>
    %c0_i32_1 = arith.constant 0 : i32
    %7 = vector.broadcast %c0_i32_1 : i32 to vector<128x1xi32>
    %8 = arith.cmpi slt, %4, %7 : vector<128x1xi32>
    %c0_i32_2 = arith.constant 0 : i32
    %9 = arith.cmpi slt, %2, %c0_i32_2 : i32
    %10 = vector.broadcast %9 : i1 to vector<128x1xi1>
    %11 = vector.broadcast %10 : vector<128x1xi1> to vector<128x1xi1>
    %12 = arith.xori %8, %11 : vector<128x1xi1>
    %13 = arith.andi %12, %6 : vector<128x1xi1>
    %14 = vector.broadcast %2 : i32 to vector<128x1xi32>
    %15 = arith.addi %4, %14 : vector<128x1xi32>
    %16 = arith.select %13, %15, %4 : vector<128x1xi1>, vector<128x1xi32>
    %c0_i32_3 = arith.constant 0 : i32
    %17 = vector.broadcast %c0_i32_3 : i32 to vector<128x1xi32>
    %18 = arith.cmpi ne, %16, %17 : vector<128x1xi32>
    %c15_i32 = arith.constant 15 : i32
    %19 = vector.broadcast %c15_i32 : i32 to vector<128x1xi32>
    %20 = arith.cmpi ne, %16, %19 : vector<128x1xi32>
    %c0 = arith.constant 0 : index
    %c0_4 = arith.constant 0 : index
    %21 = vector.load %arg1[%c0, %c0_4] : memref<128x64xbf16, #tpu.memory_space<vmem>>, vector<128x64xbf16>
    %c0_5 = arith.constant 0 : index
    %c0_6 = arith.constant 0 : index
    %22 = vector.load %arg3[%c0_5, %c0_6] : memref<64x512xbf16, #tpu.memory_space<vmem>>, vector<64x512xbf16>
    %cst = arith.constant dense<0.000000e+00> : vector<128x512xf32>
    %23 = tpu.matmul %21, %22, %cst {dimension_numbers = #tpu.dot_dimension_numbers<[1], [0], [0], [1], [0, 0, 1, 1], [], []>} : vector<128x64xbf16>, vector<64x512xbf16>, vector<128x512xf32> -> vector<128x512xf32>
    %24 = vector.extract_strided_slice %23 {offsets = [0, 0], sizes = [128, 128], strides = [1, 1]} : vector<128x512xf32> to vector<128x128xf32>
    %c1_i32_7 = arith.constant 1 : i32
    %25 = tpu.dynamic_rotate %24 by %c1_i32_7 dim 0 : vector<128x128xf32>, i32 -> vector<128x128xf32>
    %cst_8 = arith.constant 0.000000e+00 : f32
    %26 = vector.shape_cast %18 : vector<128x1xi1> to vector<128x1xi1>
    %27 = vector.broadcast %26 : vector<128x1xi1> to vector<128x128xi1>
    %28 = vector.broadcast %cst_8 : f32 to vector<128x128xf32>
    %29 = arith.select %27, %25, %28 : vector<128x128xi1>, vector<128x128xf32>
    %30 = vector.extract_strided_slice %23 {offsets = [0, 128], sizes = [128, 128], strides = [1, 1]} : vector<128x512xf32> to vector<128x128xf32>
    %31 = vector.extract_strided_slice %23 {offsets = [0, 256], sizes = [128, 128], strides = [1, 1]} : vector<128x512xf32> to vector<128x128xf32>
    %c127_i32 = arith.constant 127 : i32
    %32 = tpu.dynamic_rotate %31 by %c127_i32 dim 0 : vector<128x128xf32>, i32 -> vector<128x128xf32>
    %cst_9 = arith.constant 0.000000e+00 : f32
    %33 = vector.shape_cast %20 : vector<128x1xi1> to vector<128x1xi1>
    %34 = vector.broadcast %33 : vector<128x1xi1> to vector<128x128xi1>
    %35 = vector.broadcast %cst_9 : f32 to vector<128x128xf32>
    %36 = arith.select %34, %32, %35 : vector<128x128xi1>, vector<128x128xf32>
    %37 = arith.addf %29, %30 : vector<128x128xf32>
    %38 = arith.addf %37, %36 : vector<128x128xf32>
    %c0_10 = arith.constant 0 : index
    %c0_11 = arith.constant 0 : index
    %39 = vector.load %arg5[%c0_10, %c0_11] : memref<1x128xf32, #tpu.memory_space<vmem>>, vector<1x128xf32>
    %40 = vector.broadcast %39 : vector<1x128xf32> to vector<128x128xf32>
    %41 = arith.addf %38, %40 : vector<128x128xf32>
    %42 = arith.negf %41 : vector<128x128xf32>
    %43 = math.exp %42 : vector<128x128xf32>
    %cst_12 = arith.constant 1.000000e+00 : f32
    %44 = vector.broadcast %cst_12 : f32 to vector<128x128xf32>
    %45 = arith.addf %44, %43 : vector<128x128xf32>
    %46 = arith.divf %44, %45 : vector<128x128xf32>
    %47 = arith.mulf %41, %46 : vector<128x128xf32>
    %c0_13 = arith.constant 0 : index
    %c0_14 = arith.constant 0 : index
    %48 = vector.load %arg2[%c0_13, %c0_14] : memref<128x128xf32, #tpu.memory_space<vmem>>, vector<128x128xf32>
    %49 = arith.addf %47, %48 : vector<128x128xf32>
    %50 = arith.negf %49 : vector<128x128xf32>
    %51 = math.exp %50 : vector<128x128xf32>
    %cst_15 = arith.constant 1.000000e+00 : f32
    %52 = vector.broadcast %cst_15 : f32 to vector<128x128xf32>
    %53 = arith.addf %52, %51 : vector<128x128xf32>
    %54 = arith.divf %52, %53 : vector<128x128xf32>
    %55 = arith.mulf %49, %54 : vector<128x128xf32>
    %56 = arith.truncf %55 : vector<128x128xf32> to vector<128x128xbf16>
    %c0_16 = arith.constant 0 : index
    %c0_17 = arith.constant 0 : index
    %57 = vector.load %arg4[%c0_16, %c0_17] : memref<128x384xbf16, #tpu.memory_space<vmem>>, vector<128x384xbf16>
    %cst_18 = arith.constant dense<0.000000e+00> : vector<128x384xf32>
    %58 = tpu.matmul %56, %57, %cst_18 {dimension_numbers = #tpu.dot_dimension_numbers<[1], [0], [0], [1], [0, 0, 1, 1], [], []>} : vector<128x128xbf16>, vector<128x384xbf16>, vector<128x384xf32> -> vector<128x384xf32>
    %59 = vector.extract_strided_slice %58 {offsets = [0, 0], sizes = [128, 128], strides = [1, 1]} : vector<128x384xf32> to vector<128x128xf32>
    %c1_i32_19 = arith.constant 1 : i32
    %60 = tpu.dynamic_rotate %59 by %c1_i32_19 dim 0 : vector<128x128xf32>, i32 -> vector<128x128xf32>
    %cst_20 = arith.constant 0.000000e+00 : f32
    %61 = vector.shape_cast %18 : vector<128x1xi1> to vector<128x1xi1>
    %62 = vector.broadcast %61 : vector<128x1xi1> to vector<128x128xi1>
    %63 = vector.broadcast %cst_20 : f32 to vector<128x128xf32>
    %64 = arith.select %62, %60, %63 : vector<128x128xi1>, vector<128x128xf32>
    %65 = vector.extract_strided_slice %58 {offsets = [0, 128], sizes = [128, 128], strides = [1, 1]} : vector<128x384xf32> to vector<128x128xf32>
    %66 = vector.extract_strided_slice %58 {offsets = [0, 256], sizes = [128, 128], strides = [1, 1]} : vector<128x384xf32> to vector<128x128xf32>
    %c127_i32_21 = arith.constant 127 : i32
    %67 = tpu.dynamic_rotate %66 by %c127_i32_21 dim 0 : vector<128x128xf32>, i32 -> vector<128x128xf32>
    %cst_22 = arith.constant 0.000000e+00 : f32
    %68 = vector.shape_cast %20 : vector<128x1xi1> to vector<128x1xi1>
    %69 = vector.broadcast %68 : vector<128x1xi1> to vector<128x128xi1>
    %70 = vector.broadcast %cst_22 : f32 to vector<128x128xf32>
    %71 = arith.select %69, %67, %70 : vector<128x128xi1>, vector<128x128xf32>
    %72 = arith.addf %64, %65 : vector<128x128xf32>
    %73 = arith.addf %72, %71 : vector<128x128xf32>
    %74 = vector.extract_strided_slice %23 {offsets = [0, 384], sizes = [128, 128], strides = [1, 1]} : vector<128x512xf32> to vector<128x128xf32>
    %75 = arith.addf %73, %74 : vector<128x128xf32>
    %c0_23 = arith.constant 0 : index
    %c0_24 = arith.constant 0 : index
    %76 = vector.load %arg6[%c0_23, %c0_24] : memref<1x128xf32, #tpu.memory_space<vmem>>, vector<1x128xf32>
    %77 = vector.broadcast %76 : vector<1x128xf32> to vector<128x128xf32>
    %78 = arith.addf %75, %77 : vector<128x128xf32>
    %c0_25 = arith.constant 0 : index
    %c0_26 = arith.constant 0 : index
    %79 = vector.load %arg7[%c0_25, %c0_26] : memref<128x128xf32, #tpu.memory_space<vmem>>, vector<128x128xf32>
    tpu.vector_store %arg7[%c0_25, %c0_26], %78 {strides = array<i32>} : memref<128x128xf32, #tpu.memory_space<vmem>>, vector<128x128xf32>,
    return
  }
  func.func @transform_0(%arg0: i32) -> (i32, i32) {
    %c0_i32 = arith.constant 0 : i32
    %c0_i32_0 = arith.constant 0 : i32
    return %arg0, %c0_i32 : i32, i32
  }
  func.func @transform_1(%arg0: i32) -> (i32, i32) {
    %c0_i32 = arith.constant 0 : i32
    %c0_i32_0 = arith.constant 0 : i32
    return %arg0, %c0_i32 : i32, i32
  }
  func.func @transform_2(%arg0: i32) -> (i32, i32) {
    %c0_i32 = arith.constant 0 : i32
    %c0_i32_0 = arith.constant 0 : i32
    %c0_i32_1 = arith.constant 0 : i32
    return %c0_i32, %c0_i32_0 : i32, i32
  }
  func.func @transform_3(%arg0: i32) -> (i32, i32) {
    %c0_i32 = arith.constant 0 : i32
    %c0_i32_0 = arith.constant 0 : i32
    %c0_i32_1 = arith.constant 0 : i32
    return %c0_i32, %c0_i32_0 : i32, i32
  }
  func.func @transform_4(%arg0: i32) -> (i32, i32) {
    %c0_i32 = arith.constant 0 : i32
    %c0_i32_0 = arith.constant 0 : i32
    %c0_i32_1 = arith.constant 0 : i32
    return %c0_i32, %c0_i32_0 : i32, i32
  }
  func.func @transform_5(%arg0: i32) -> (i32, i32) {
    %c0_i32 = arith.constant 0 : i32
    %c0_i32_0 = arith.constant 0 : i32
    %c0_i32_1 = arith.constant 0 : i32
    return %c0_i32, %c0_i32_0 : i32, i32
  }
  func.func @transform_6(%arg0: i32) -> (i32, i32) {
    %c0_i32 = arith.constant 0 : i32
    %c0_i32_0 = arith.constant 0 : i32
    return %arg0, %c0_i32 : i32, i32
  }
}

</mosaic_0001>

<bundles_post_ra>
// kernel: tpu_custom_call.1
= control target key start
LH: loop header
LB: loop body
LE: loop exit
PB: predicated region body
PF: predicated region fallthrough
CT: control target
= control target key end

     0   :  { %11 = vsyncpa [#allocation3], 0  ;;  %s3640_s0 = inlined_call_operand.vmem [shape: bf16[256,64], index: 0, kind: input, shape index: {}]   ;;  %s3641_s1 = inlined_call_operand.hbm [shape: f32[256,128], index: 1, kind: input, shape index: {}]   ;;  %s3642_s2 = inlined_call_operand.hbm [shape: bf16[64,512], index: 2, kind: input, shape index: {}]   ;;  %s3643_s3 = inlined_call_operand.vmem [shape: bf16[128,384], index: 3, kind: input, shape index: {}]   ;;  %s3644_s4 = inlined_call_operand.vmem [shape: f32[1,128], index: 4, kind: input, shape index: {}]   ;;  %s3645_s5 = inlined_call_operand.vmem [shape: f32[1,128], index: 5, kind: input, shape index: {}]   ;;  %s3646_s6 = inlined_call_operand.hbm [shape: f32[256,128], index: 6, kind: output, shape index: {}]  }
   0x1   :  { %13 = vsyncpa [#allocation3 + $0x1], 0 }
   0x2   :  { %14 = vsyncpa [#allocation6], 0 }
   0x3   :  { %15 = vsyncpa [#allocation4], 0 }
   0x4   :  { %17 = vsyncpa [#allocation4 + $0x1], 0  ;;  %s2696_s21 = smov 0   ;;  %s2698_s22 = smov 0  }
   0x5   :  { %s2700_s23 = smov 0   ;;  %s2702_s24 = smov 0  }
   0x6 LB: > { %s2717_s25 = sadd.s32 4294967295, %s2649_s24   ;;  %s2097_s26 = sadd.s32 4294967294, %s2649_s24   ;;  %s2649_s24 = sphi %s2702_s24, %s3750_s24   ;;  %s2645_s23 = sphi %s2700_s23, %s3749_s23   ;;  %s2641_s22 = sphi %s2698_s22, %s3748_s22   ;;  %s2637_s21 = sphi %s2696_s21, %s3747_s21  }
   0x7   : > { %p69_p0 = scmp.ne.s32.totalorder %s2641_s22, %s2637_s21  ;;  %p3647_p1 = scmp.eq.s32.totalorder %s2717_s25, 0 }
   0x8   : > { %p183_p3 = scmp.eq.s32.totalorder %s2097_s26, 1  ;;  %p2098_p5 = scmp.ge.s32.totalorder %s2649_s24, 1 }
   0x9   : > { %p2726_p4 = por %p3647_p1, %p69_p0  ;;  %p190_p7 = scmp.lt.s32.totalorder %s2649_s24, 3 }
   0xa   : > { %p2731_p6 = por %p183_p3, %p69_p0  ;;  %s2651_s30 = smov [#allocation5]  }
   0xb   : > { %s3659_s27 = scalar_select %p2726_p4, 1, 0 }
   0xc   : > { %s3660_s28 = scalar_select %p2731_p6, 1, 0 }
   0xd   : > { %p2736_p8 = pnand %p2098_p5, %p190_p7  ;;  %s202_s7 = sshll.u32 %s2651_s30, 4  ;;  %s203_s7 = int_to_ptr.vmem [resolvable:$true] %s202_s7 }
   0xe   : > { %s2750_s9 = sadd.s32 1, %s2649_s24   ;;  %s56_s10 = sadd.s32 1, %s2645_s23 }
   0xf   : > { %s3661_s29 = scalar_select %p2736_p8, 1, 0 }
  0x10   : > { %p2279_p9 = pneg %p2736_p8  ;;  %s53_s11 = ssub.s32 %s2649_s24, %s2750_s9 }
  0x11   : > { %s2538_s12 = scalar_lea.vmem %s203_s7, 2048  ;;  %p2546_p5 = scmp.lt.s32.totalorder %s203_s7, %s203_s7 }
  0x12   : > { %p2745_p11 = pnand %p2279_p9, %p3647_p1  ;;  %p2539_p13 = scmp.ne.s32.totalorder %s203_s7, %s2538_s12 }
  0x13   : > { %p2547_p7 = scmp.lt.s32.totalorder %s2538_s12, %s2538_s12 }
  0x14   : > { %p2529_p12 = pneg %p2745_p11 }
  0x15   : > { %p2548_p10 = por %p2547_p7, %p2546_p5 }
  0x16   : > { %p2541_p0 = pnand %p2539_p13, %p2529_p12 }
  0x18   : > { %p2542_p3 = pneg %p2541_p0 }
  0x1a   : > { %p2549_p2 = pnand %p2548_p10, %p2542_p3 }
  0x1c   : > { %2552 = shalt.err (!%p2549_p2)
}
  0x1d   : > { %s2652_s13 = smov 256   ;;  %s2653_s14 = smov 16  }
  0x1e   : > { %2282 = dma.hbm_to_vmem [thread:$0]  (!%p2745_p11), %s3642_s2, 2048, %s203_s7, [#allocation6], %s2652_s13, %s2652_s13, %s2653_s14  }
  0x1f   : > { %p54_p9 = scmp.eq.s32.totalorder %s53_s11, 0  ;;  %p63_p12 = scmp.ne.s32.totalorder %s2645_s23, %s2641_s22 }
  0x20   : > { %p64_p10 = scmp.eq.s32.totalorder %s2649_s24, 0  ;;  %p2292_p2 = scmp.lt.s32.totalorder %s2649_s24, 2 }
  0x21   : > { %s2767_s17 = scalar_select %p54_p9, %s2645_s23, %s56_s10  }
  0x22   : > { %p65_p13 = por %p64_p10, %p63_p12  ;;  %p3663_p0 = scmp.eq.s32.totalorder %s2717_s25, 1 }
  0x23   : > { %s234_s19 = sand.u32 1, %s2645_s23   ;;  %s2213_s20 = sshll.u32 %s2649_s24, 11 }
  0x24   : > { %p2771_p3 = por %p3663_p0, %p63_p12  ;;  %s2101_s26 = sshll.u32 %s234_s19, 7 }
  0x25   : > { %s2780_s12 = scalar_lea.hbm %s3641_s1, %s2213_s20  ;;  %s238_s7 = scalar_lea.vmem [#allocation2], %s2101_s26 }
  0x26   : > { %s3664_s18 = scalar_select %p2771_p3, 1, 0 }
  0x27   : > { %s245_s10 = sshll.u32 %s238_s7, 4  ;;  %p2782_p11 = pnand %p2292_p2, %p65_p13  ;;  %s2786_s10 = int_to_ptr.vmem [resolvable:$true] %s245_s10 }
  0x28   : > { %s2788_s13 = scalar_lea.sflag [#allocation3], %s234_s19  ;;  %s2553_s14 = scalar_lea.hbm %s2780_s12, 2048 }
  0x29   : > { %p2554_p5 = scmp.ne.s32.totalorder %s2780_s12, %s2553_s14  ;;  %p2555_p7 = pneg %p2782_p11 }
  0x2a   : > { %s2558_s20 = scalar_lea.hbm %s3641_s1, 4096  ;;  %p2559_p10 = scmp.lt.s32.totalorder %s2780_s12, %s3641_s1 }
  0x2b   : > { %p2556_p9 = pnand %p2555_p7, %p2554_p5  ;;  %p2560_p2 = scmp.lt.s32.totalorder %s2558_s20, %s2553_s14 }
  0x2d   : > { %p2557_p12 = pneg %p2556_p9  ;;  %p2561_p13 = por %p2560_p2, %p2559_p10 }
  0x2f   : > { %p2562_p0 = pnand %p2561_p13, %p2557_p12 }
  0x31   : > { %2565 = shalt.err (!%p2562_p0)
}
  0x32   : > { %s2566_s19 = scalar_lea.vmem %s2786_s10, 2048  ;;  %s2654_s8 = smov [#allocation2]  }
  0x33   : > { %p2567_p1 = scmp.ne.s32.totalorder %s2786_s10, %s2566_s19  ;;  %s2571_s7 = sshll.u32 %s2654_s8, 4  ;;  %s2572_s7 = int_to_ptr.vmem [resolvable:$false] %s2571_s7 }
  0x34   : > { %s2573_s15 = scalar_lea.vmem %s2572_s7, 4096  ;;  %p2574_p9 = scmp.lt.s32.totalorder %s2786_s10, %s2572_s7 }
  0x35   : > { %p2569_p6 = pnand %p2567_p1, %p2555_p7  ;;  %p2575_p3 = scmp.lt.s32.totalorder %s2573_s15, %s2566_s19 }
  0x37   : > { %p2570_p5 = pneg %p2569_p6  ;;  %p2576_p4 = por %p2575_p3, %p2574_p9 }
  0x39   : > { %p2577_p8 = pnand %p2576_p4, %p2570_p5 }
  0x3b   : > { %2580 = shalt.err (!%p2577_p8)
}
  0x3c   : > { %s2655_s14 = smov 128   ;;  %s2656_s16 = smov 8  }
  0x3d   : > { %2286 = dma.hbm_to_vmem [thread:$0]  (!%p2782_p11), %s2780_s12, 2048, %s2786_s10, %s2788_s13, %s2655_s14, %s2655_s14, %s2656_s16  }
  0x3e   : > { %p3666_p1 = scmp.ne.s32.totalorder %s3661_s29, 0 }
  0x40   : > { %257 = sbr.rel (%p3666_p1) target bundleno = 675 (0x2a3), region = 44 }
  0x45   : > { %s2812_s20 = sand.u32 1, %s2641_s22   ;;  %p3667_p4 = scmp.ne.s32.totalorder %s3659_s27, 0 }
  0x46   : > { %s2105_s26 = sshll.u32 %s2812_s20, 7  ;;  %s260_s30 = scalar_lea.sflag [#allocation3], %s2812_s20 }
  0x47   : > { %s2818_s19 = scalar_lea.vmem [#allocation2], %s2105_s26 }
  0x48   : > { %2624 = dma.done.wait (%p3667_p4), %s260_s30, 2048  }
  0x49   : > { %2626 = vsyncadd (%p3667_p4), %s260_s30, 4294965248  ;;  %p3668_p6 = scmp.eq.s32.totalorder %s2717_s25, 0 }
  0x4b   : > { %2628 = dma.done.wait (%p3668_p6), [#allocation6], 2048   ;;  %p3669_p8 = pmov %p3668_p6 }
  0x4c   : > { %s2108_s29 = sshll.u32 %s2717_s25, 4  ;;  %v3651_v0 = vmov 0   ;;  %v2335_v1 = vld [vmem:[#allocation5 + $0x64] ss:$16 sps:$4 sm:$0xff]   ;;  %v2337_v2 = vld [vmem:[#allocation5 + $0x60] ss:$16 sps:$4 sm:$0xff]   ;;  %v310_v49 = vlaneseq }
  0x4d   : > { %2630 = vsyncadd (%p3669_p8), [#allocation6], 4294965248  ;;  %760 = vmatprep.mubr.bf16.mxu0 %v3651_v0  ;;  %820 = vmatprep.mubr.bf16.mxu1 %v3651_v0  ;;  %p302_p3 = scmp.lt.s32.totalorder %s2108_s29, 31  ;;  %v2338_v3 = vld [vmem:[#allocation5 + $0x44] ss:$16 sps:$4 sm:$0xff]   ;;  %vm703_vm0 = vcmask 523264  }
  0x4e   : > { %736 = vmatprep.subr.bf16.mxu0 %v2335_v1  ;;  %2263 = vmatprep.subr.bf16.mxu1 %v2335_v1  ;;  %v2340_v4 = vld [vmem:[#allocation5 + $0x40] ss:$16 sps:$4 sm:$0xff]   ;;  %v2341_v5 = vld [vmem:[#allocation5 + $0x24] ss:$16 sps:$4 sm:$0xff]   ;;  %v2351_v9 = vld [vmem:[#allocation5 + $0x6c] ss:$16 sps:$4 sm:$0xff]  }
  0x4f   : > { %s3752_s29 = smov (!%p302_p3, %s2108_s29), 31  ;;  %737 = vmatpush1.bf16.msra.mxu0 %v2337_v2  ;;  %2267 = vmatpush1.bf16.msra.mxu1 %v2337_v2  ;;  %v2343_v6 = vld [vmem:[#allocation5 + $0x20] ss:$16 sps:$4 sm:$0xff]   ;;  %v2344_v7 = vld [vmem:[#allocation5 + $0x4] ss:$16 sps:$4 sm:$0xff]   ;;  %v2947_v50 = vshrl.u32 %v310_v49, 7 }
  0x50   : > { %s2109_s12 = sshll.u32 %s3752_s29, 2  ;;  %738 = vmatprep.subr.bf16.mxu0 %v2338_v3  ;;  %2264 = vmatprep.subr.bf16.mxu1 %v2338_v3  ;;  %v2346_v8 = vld [vmem:[#allocation5] ss:$16 sps:$4 sm:$0xff]   ;;  %v2349_v12 = vld [vmem:[#allocation5 + $0x68] ss:$16 sps:$4 sm:$0xff]   ;;  %s3453_s15 = scalar_lea.vmem [#allocation7], %s2105_s26 }
  0x51   : > { %s2834_s11 = scalar_lea.vmem %s3640_s0, %s2109_s12  ;;  %v2354_v13 = vld [vmem:[#allocation5 + $0x4c] ss:$16 sps:$4 sm:$0xff]   ;;  %v2352_v14 = vld [vmem:[#allocation5 + $0x48] ss:$16 sps:$4 sm:$0xff]   ;;  %v2372_v27 = vld [vmem:[%s3643_s3 + $0x94] ss:$12 sps:$4 sm:$0xff]  }
  0x52   : > { %v2347_v10 = vld [vmem:[%s2834_s11] sm:$0xff]   ;;  %v2348_v11 = vld [vmem:[%s2834_s11 + $0x30] sm:$0xff]   ;;  %v2359_v15 = vld [vmem:[#allocation5 + $0x2c] ss:$16 sps:$4 sm:$0xff]   ;;  %v325_v53 = vadd.s32 112, %v2947_v50  ;;  %vm3654_vm1 = vcmp.lt.s32.totalorder %v2947_v50, 1 }
  0x53   : > { %739 = vmatpush1.bf16.msra.mxu0 %v2340_v4  ;;  %2268 = vmatpush1.bf16.msra.mxu1 %v2340_v4  ;;  %v2355_v16 = vld [vmem:[%s2834_s11 + $0x8] sm:$0xff]   ;;  %v2356_v17 = vld [vmem:[%s2834_s11 + $0x38] sm:$0xff]   ;;  %v2363_v21 = vld [vmem:[%s2834_s11 + $0x10] sm:$0xff]   ;;  %vm3657_vm4 = vcmp.lt.s32.totalorder %v2947_v50, 7  ;;  %s2214_s26 = sshll.u32 %s2717_s25, 11  ;;  %s2002_s14 = sshll.u32 %s3453_s15, 4  ;;  %s3594_s14 = int_to_ptr.vmem [resolvable:$true] %s2002_s14 }
  0x54   : > { %740 = vmatprep.subr.bf16.mxu0 %v2341_v5  ;;  %2265 = vmatprep.subr.bf16.mxu1 %v2341_v5  ;;  %v2357_v18 = vld [vmem:[#allocation5 + $0x28] ss:$16 sps:$4 sm:$0xff]   ;;  %v2362_v19 = vld [vmem:[#allocation5 + $0xc] ss:$16 sps:$4 sm:$0xff]   ;;  %v2365_v23 = vld [vmem:[%s2834_s11 + $0x20] sm:$0xff]   ;;  %v429_v60 = vand.u32 15, %v325_v53  ;;  %s3592_s29 = scalar_lea.hbm %s3646_s6, %s2214_s26 }
  0x55   : > { %v2360_v20 = vld [vmem:[#allocation5 + $0x8] ss:$16 sps:$4 sm:$0xff]   ;;  %v2370_v28 = vld [vmem:[%s3643_s3 + $0x90] ss:$12 sps:$4 sm:$0xff]   ;;  %v2377_v34 = vld [vmem:[%s3643_s3 + $0x60] ss:$12 sps:$4 sm:$0xff]  }
  0x56   : > { %v2364_v22 = vld [vmem:[%s2834_s11 + $0x18] sm:$0xff]   ;;  %v2366_v24 = vld [vmem:[%s2834_s11 + $0x28] sm:$0xff]   ;;  %v2379_v32 = vld [vmem:[%s3643_s3 + $0x64] ss:$12 sps:$4 sm:$0xff]   ;;  %vm2964_vm2 = vcmp.ne.s32.totalorder %v429_v60, 0  ;;  %s1989_s25 = scalar_lea.sflag [#allocation4], %s2812_s20 }
  0x57   : > { %741 = vmatpush1.bf16.msra.mxu0 %v2343_v6  ;;  %2269 = vmatpush1.bf16.msra.mxu1 %v2343_v6  ;;  %v2369_v25 = vld [vmem:[%s3643_s3 + $0xac] ss:$12 sps:$4 sm:$0xff]   ;;  %v2367_v26 = vld [vmem:[%s3643_s3 + $0xa8] ss:$12 sps:$4 sm:$0xff]   ;;  %v2376_v30 = vld [vmem:[%s3643_s3 + $0xb0] ss:$12 sps:$4 sm:$0xff]  }
  0x58   : > { %742 = vmatprep.subr.bf16.mxu0 %v2344_v7  ;;  %2266 = vmatprep.subr.bf16.mxu1 %v2344_v7  ;;  %v2375_v29 = vld [vmem:[%s3643_s3 + $0x7c] ss:$12 sps:$4 sm:$0xff]   ;;  %v2373_v31 = vld [vmem:[%s3643_s3 + $0x78] ss:$12 sps:$4 sm:$0xff]   ;;  %v2387_v36 = vld [vmem:[%s3643_s3 + $0x80] ss:$12 sps:$4 sm:$0xff]  }
  0x59   : > { %v2383_v33 = vld [vmem:[%s3643_s3 + $0x98] ss:$12 sps:$4 sm:$0xff]   ;;  %v2380_v37 = vld [vmem:[%s3643_s3 + $0x48] ss:$12 sps:$4 sm:$0xff]   ;;  %v2384_v40 = vld [vmem:[%s3643_s3 + $0x30] ss:$12 sps:$4 sm:$0xff]  }
  0x5a   : > { %v2382_v35 = vld [vmem:[%s3643_s3 + $0x4c] ss:$12 sps:$4 sm:$0xff]   ;;  %v2386_v38 = vld [vmem:[%s3643_s3 + $0x34] ss:$12 sps:$4 sm:$0xff]   ;;  %v2390_v41 = vld [vmem:[%s3643_s3 + $0x1c] ss:$12 sps:$4 sm:$0xff]  }
  0x5b   : > { %743 = vmatpush1.bf16.msra.mxu0 %v2346_v8  ;;  %2270 = vmatpush1.bf16.msra.mxu1 %v2346_v8  ;;  %v2391_v39 = vld [vmem:[%s3643_s3 + $0x68] ss:$12 sps:$4 sm:$0xff]   ;;  %v2392_v42 = vld [vmem:[%s3643_s3 + $0x50] ss:$12 sps:$4 sm:$0xff]   ;;  %v2388_v43 = vld [vmem:[%s3643_s3 + $0x18] ss:$12 sps:$4 sm:$0xff]  }
  0x5c   : > { %849 = vmatprep.subr.bf16.mxu1 %v2351_v9  ;;  %1595 = vmatprep.subr.bf16.mxu0 %v2369_v25  ;;  %v2395_v44 = vld [vmem:[%s3643_s3 + $0x4] ss:$12 sps:$4 sm:$0xff]   ;;  %v2393_v46 = vld [vmem:[%s3643_s3] ss:$12 sps:$4 sm:$0xff]   ;;  %v2398_v48 = vld [vmem:[%s3643_s3 + $0x8] ss:$12 sps:$4 sm:$0xff]  }
  0x5d   : > { %v2396_v45 = vld [vmem:[%s3643_s3 + $0x38] ss:$12 sps:$4 sm:$0xff]   ;;  %v2397_v47 = vld [vmem:[%s3643_s3 + $0x20] ss:$12 sps:$4 sm:$0xff]   ;;  %v312_v25 = vadd.s32 8, %v2947_v50  ;;  %s2581_s12 = scalar_lea.vmem %s3594_s14, 2048 }
  0x5e   : > { %2134 = vmatmul.mubr.msk.bf16.vlgmr.msra.gmra.mxu0 %vm703_vm0, %v2347_v10  ;;  %2140 = vmatmul.mubr.msk.bf16.vlgmr.msra.gmra.mxu1 %vm703_vm0, %v2348_v11  ;;  %p2582_p11 = scmp.ne.s32.totalorder %s3594_s14, %s2581_s12  ;;  %p3744_p7 = scmp.ne.s32.totalorder %s3664_s18, 0 }
  0x5f   : > { %850 = vmatpush1.bf16.msra.mxu1 %v2349_v12  ;;  %770 = vmatprep.mubr.bf16.mxu0 %v3651_v0  ;;  %v331_v12 = vand.u32 15, %v2947_v50  ;;  %s2658_s27 = smov [#allocation7]  }
  0x60   : > { %851 = vmatprep.subr.bf16.mxu1 %v2354_v13  ;;  %830 = vmatprep.mubr.bf16.mxu1 %v3651_v0  ;;  %p2583_p12 = pnand %p2582_p11, %p3744_p7  ;;  %s2585_s10 = sshll.u32 %s2658_s27, 4  ;;  %s2586_s10 = int_to_ptr.vmem [resolvable:$false] %s2585_s10 }
  0x61   : > { %1596 = vmatpush1.bf16.msra.mxu0 %v2367_v26  ;;  %vm2984_vm3 = vcmp.ne.s32.totalorder %v331_v12, 0  ;;  %s2587_s11 = scalar_lea.vmem %s2586_s10, 4096  ;;  %p2588_p2 = scmp.lt.s32.totalorder %s3594_s14, %s2586_s10 }
  0x62   : > { %1597 = vmatprep.subr.bf16.mxu0 %v2372_v27  ;;  %p2584_p10 = pneg %p2583_p12  ;;  %p2589_p13 = scmp.lt.s32.totalorder %s2587_s11, %s2581_s12 }
  0x63   : > { %852 = vmatpush1.bf16.msra.mxu1 %v2352_v14 }
  0x64   : > { %853 = vmatprep.subr.bf16.mxu1 %v2359_v15  ;;  %p2590_p0 = por %p2589_p13, %p2588_p2 }
  0x65   : > { %1598 = vmatpush1.bf16.msra.mxu0 %v2370_v28 }
  0x66   : > { %2135 = vmatmul.mubr.msk.bf16.gmra.mxu0 %vm703_vm0, %v2355_v16  ;;  %2141 = vmatmul.mubr.msk.bf16.gmra.mxu1 %vm703_vm0, %v2356_v17  ;;  %p2591_p5 = pnand %p2590_p0, %p2584_p10 }
  0x67   : > { %854 = vmatpush1.bf16.msra.mxu1 %v2357_v18  ;;  %780 = vmatprep.mubr.bf16.mxu0 %v3651_v0 }
  0x68   : > { %855 = vmatprep.subr.bf16.mxu1 %v2362_v19  ;;  %873 = vmatprep.mubr.bf16.mxu1 %v3651_v0  ;;  %v313_v19 = vadd.s32 16, %v2947_v50 }
  0x69   : > { %1599 = vmatprep.subr.bf16.mxu0 %v2375_v29 }
  0x6a   : > { %1600 = vmatpush1.bf16.msra.mxu0 %v2373_v31  ;;  %v345_v31 = vand.u32 15, %v313_v19 }
  0x6b   : > { %856 = vmatpush1.bf16.msra.mxu1 %v2360_v20  ;;  %1601 = vmatprep.subr.bf16.mxu0 %v2379_v32  ;;  %v3672_v20 = vmov 0 }
  0x6c   : > { %2231 = vmatprep.subr.bf16.mxu1 %v2376_v30  ;;  %v3673_v20 = vsel %vm2984_vm3, 4294967295, %v3672_v20  ;;  %vm3025_vm5 = vcmp.ne.s32.totalorder %v345_v31, 0 }
  0x6d   : > { %3674 = vst [vmem:[#allocation11_spill] sm:$0xff] %v3673_v20 }
  0x6e   : > { %2136 = vmatmul.mubr.msk.bf16.gmra.mxu0 %vm703_vm0, %v2363_v21  ;;  %2142 = vmatmul.mubr.msk.bf16.vlgmr.msra.gmra.mxu1 %vm703_vm0, %v2347_v10 }
  0x6f   : > { %790 = vmatprep.mubr.bf16.mxu0 %v3651_v0  ;;  %883 = vmatprep.mubr.bf16.mxu1 %v3651_v0 }
  0x70   : > { %2232 = vmatpush3.bf16.msra.mxu1 %v2376_v30  ;;  %1602 = vmatpush1.bf16.msra.mxu0 %v2377_v34 }
  0x71   : > { %2233 = vmatprep.subr.bf16.mxu1 %v2383_v33  ;;  %1603 = vmatprep.subr.bf16.mxu0 %v2382_v35 }
  0x74   : > { %2234 = vmatpush3.bf16.msra.mxu1 %v2383_v33  ;;  %1604 = vmatpush1.bf16.msra.mxu0 %v2380_v37 }
  0x75   : > { %2235 = vmatprep.subr.bf16.mxu1 %v2387_v36  ;;  %1605 = vmatprep.subr.bf16.mxu0 %v2386_v38  ;;  %v315_v38 = vadd.s32 32, %v2947_v50 }
  0x76   : > { %2137 = vmatmul.mubr.msk.bf16.gmra.mxu0 %vm703_vm0, %v2364_v22  ;;  %2143 = vmatmul.mubr.msk.bf16.gmra.mxu1 %vm703_vm0, %v2355_v16 }
  0x77   : > { %800 = vmatprep.mubr.bf16.mxu0 %v3651_v0  ;;  %893 = vmatprep.mubr.bf16.mxu1 %v3651_v0 }
  0x78   : > { %2236 = vmatpush3.bf16.msra.mxu1 %v2387_v36  ;;  %1606 = vmatpush1.bf16.msra.mxu0 %v2384_v40  ;;  %v338_v36 = vand.u32 15, %v312_v25 }
  0x79   : > { %2237 = vmatprep.subr.bf16.mxu1 %v2391_v39  ;;  %1607 = vmatprep.subr.bf16.mxu0 %v2390_v41 }
  0x7a   : > { %vm3033_vm6 = vcmp.ne.s32.totalorder %v338_v36, 15  ;;  %v319_v36 = vadd.s32 64, %v2947_v50 }
  0x7c   : > { %2238 = vmatpush3.bf16.msra.mxu1 %v2391_v39  ;;  %1608 = vmatpush1.bf16.msra.mxu0 %v2388_v43  ;;  %v314_v43 = vadd.s32 24, %v2947_v50 }
  0x7d   : > { %2239 = vmatprep.subr.bf16.mxu1 %v2392_v42  ;;  %1609 = vmatprep.subr.bf16.mxu0 %v2395_v44 }
  0x7e   : > { %2138 = vmatmul.mubr.msk.bf16.gmra.mxu0 %vm703_vm0, %v2365_v23  ;;  %2144 = vmatmul.mubr.msk.bf16.gmra.mxu1 %vm703_vm0, %v2363_v21 }
  0x7f   : > { %810 = vmatprep.mubr.bf16.mxu0 %v3651_v0  ;;  %903 = vmatprep.mubr.bf16.mxu1 %v3651_v0 }
  0x80   : > { %2240 = vmatpush3.bf16.msra.mxu1 %v2392_v42  ;;  %1610 = vmatpush1.bf16.msra.mxu0 %v2393_v46  ;;  %v3020_v42 = vld [vmem:[%s3644_s4] ss:$0 sm:$0xff] }
  0x81   : > { %2241 = vmatprep.subr.bf16.mxu1 %v2396_v45 }
  0x84   : > { %2242 = vmatpush3.bf16.msra.mxu1 %v2396_v45 }
  0x85   : > { %2243 = vmatprep.subr.bf16.mxu1 %v2397_v47 }
  0x86   : > { %2139 = vmatmul.mubr.msk.bf16.gmra.mxu0 %vm703_vm0, %v2366_v24  ;;  %2145 = vmatmul.mubr.msk.bf16.gmra.mxu1 %vm703_vm0, %v2364_v22 }
  0x87   : > { %913 = vmatprep.mubr.bf16.mxu1 %v3651_v0  ;;  %1627 = vmatprep.mubr.bf16.mxu0 %v3651_v0 }
  0x88   : > { %2244 = vmatpush3.bf16.msra.mxu1 %v2397_v47 }
  0x89   : > { %2245 = vmatprep.subr.bf16.mxu1 %v2398_v48 }
  0x8c   : > { %2246 = vmatpush3.bf16.msra.mxu1 %v2398_v48 }
  0x8e   : > { %2146 = vmatmul.mubr.msk.bf16.gmra.mxu1 %vm703_vm0, %v2365_v23 }
  0x8f   : > { %923 = vmatprep.mubr.bf16.mxu1 %v3651_v0 }
  0x96   : > { %2147 = vmatmul.mubr.msk.bf16.gmra.mxu1 %vm703_vm0, %v2366_v24 }
  0x97   : > { %933 = vmatprep.mubr.bf16.mxu1 %v3651_v0 }
  0x9e   : > { %2148 = vmatmul.mubr.msk.bf16.gmra.mxu1 %vm703_vm0, %v2348_v11 }
  0x9f   : > { %943 = vmatprep.mubr.bf16.mxu1 %v3651_v0 }
  0xa6   : > { %2149 = vmatmul.mubr.msk.bf16.gmra.mxu1 %vm703_vm0, %v2356_v17 }
 0x11e   : > { %v762_v51 = vpop.f32.mrf.mxu0  ;;  %v2949_v52 = vpop.f32.mrf.mxu1 }
 0x11f   : > { %v966_v58 = vrot.slane %v2949_v52, 7  ;;  %v954_v9 = vrot.slane %v762_v51, 7  ;;  %v320_v52 = vadd.s32 72, %v2947_v50 }
 0x120   : > { %v764_v54 = vpop.f32.mrf.mxu0  ;;  %v2952_v55 = vpop.f32.mrf.mxu1 }
 0x122   : > { %v766_v56 = vpop.f32.mrf.mxu0  ;;  %v826_v57 = vpop.f32.mrf.mxu1 }
 0x123   : > { %v967_v59 = vrot.slane %v826_v57, 7  ;;  %v955_v29 = vrot.slane %v766_v56, 7 }
 0x124   : > { %v768_v61 = vpop.f32.mrf.mxu0  ;;  %v828_v62 = vpop.f32.mrf.mxu1 }
 0x125   : > { %v973_v63 = vsel %vm3654_vm1, %v966_v58, %v967_v59  ;;  %v985_v44 = vsel %vm3654_vm1, %v954_v9, %v955_v29 }
 0x126   : > { %v2960_v1 = vadd.f32 %v973_v63, %v828_v62  ;;  %v2962_v2 = vpop.f32.mrf.mxu0  ;;  %v832_v3 = vpop.f32.mrf.mxu1  ;;  %v1117_v60 = vadd.f32 %v985_v44, %v768_v61  ;;  %v323_v44 = vadd.s32 96, %v2947_v50 }
 0x127   : > { %v968_v4 = vrot.slane %v832_v3, 7  ;;  %v956_v30 = vrot.slane %v2962_v2, 7  ;;  %v352_v2 = vand.u32 15, %v314_v43 }
 0x128   : > { %v2968_v6 = vpop.f32.mrf.mxu0  ;;  %v834_v7 = vpop.f32.mrf.mxu1 }
 0x129   : > { %v972_v8 = vsel %vm3654_vm1, %v967_v59, %v968_v4  ;;  %v984_v46 = vsel %vm3654_vm1, %v955_v29, %v956_v30  ;;  %vm3076_vm8 = vcmp.ne.s32.totalorder %v352_v2, 15 }
 0x12a   : > { %v1033_v10 = vsel %vm2964_vm2, %v972_v8, 0.0  ;;  %v2974_v11 = vpop.f32.mrf.mxu0  ;;  %v836_v13 = vpop.f32.mrf.mxu1  ;;  %v1021_v62 = vsel %vm3025_vm5, %v984_v46, 0.0 }
 0x12b   : > { %v2977_v14 = vadd.f32 %v1033_v10, %v834_v7  ;;  %v969_v15 = vrot.slane %v836_v13, 7  ;;  %v957_v3 = vrot.slane %v2974_v11, 7  ;;  %v1118_v13 = vadd.f32 %v1021_v62, %v2968_v6 }
 0x12c   : > { %v2979_v16 = vpop.f32.mrf.mxu0  ;;  %v838_v17 = vpop.f32.mrf.mxu1 }
 0x12d   : > { %v971_v18 = vsel %vm3654_vm1, %v968_v4, %v969_v15  ;;  %v986_v21 = vsel %vm3654_vm1, %v969_v15, %v954_v9  ;;  %v317_v15 = vadd.s32 48, %v2947_v50  ;;  %v983_v6 = vsel %vm3654_vm1, %v956_v30, %v957_v3 }
 0x12e   : > { %v2990_v22 = vadd.f32 %v971_v18, %v838_v17  ;;  %v2992_v23 = vpop.f32.mrf.mxu0  ;;  %v2994_v24 = vpop.f32.mrf.mxu1  ;;  %v1019_v28 = vsel %vm2984_vm3, %v986_v21, 0.0  ;;  %v1119_v46 = vadd.f32 %v983_v6, %v2979_v16 }
 0x12f   : > { %v3653_v34 = vrot.slane %v2994_v24, 1  ;;  %v1116_v37 = vadd.f32 %v1019_v28, %v764_v54  ;;  %v359_v54 = vand.u32 15, %v315_v38  ;;  %v958_v4 = vrot.slane %v2992_v23, 7 }
 0x130   : > { %v2997_v26 = vpop.f32.mrf.mxu0  ;;  %v2999_v27 = vpop.f32.mrf.mxu1  ;;  %v373_v38 = vand.u32 15, %v317_v15 }
 0x131   : > { %3675 = vst [vmem:[#allocation12_spill] sm:$0xff] %v2999_v27  ;;  %vm3061_vm7 = vcmp.ne.s32.totalorder %v359_v54, 0  ;;  %v982_v23 = vsel %vm3654_vm1, %v957_v3, %v958_v4  ;;  %v387_v3 = vand.u32 15, %v319_v36 }
 0x132   : > { %v3004_v32 = vpop.f32.mrf.mxu0  ;;  %v879_v33 = vpop.f32.mrf.mxu1  ;;  %vm3108_vm9 = vcmp.ne.s32.totalorder %v373_v38, 0 }
 0x133   : > { %v1036_v35 = vrot.slane %v879_v33, 1  ;;  %vm3125_vm10 = vcmp.ne.s32.totalorder %v387_v3, 0 }
 0x134   : > { %v3009_v39 = vpop.f32.mrf.mxu0  ;;  %v3011_v40 = vpop.f32.mrf.mxu1 }
 0x135   : > { %v1066_v41 = vsel %vm3657_vm4, %v3653_v34, %v1036_v35 }
 0x136   : > { %v1132_v47 = vadd.f32 %v1116_v37, %v1066_v41  ;;  %v3031_v48 = vpop.f32.mrf.mxu0  ;;  %v885_v49 = vpop.f32.mrf.mxu1  ;;  %v316_v37 = vadd.s32 40, %v2947_v50 }
 0x137   : > { %v1037_v53 = vrot.slane %v885_v49, 1  ;;  %v960_v54 = vrot.slane %v3031_v48, 7  ;;  %v415_v48 = vand.u32 15, %v323_v44 }
 0x138   : > { %v3038_v56 = vadd.f32 %v3020_v42, %v1132_v47  ;;  %v3040_v57 = vpop.f32.mrf.mxu0  ;;  %v3042_v59 = vpop.f32.mrf.mxu1  ;;  %v1023_v47 = vsel %vm3061_vm7, %v982_v23, 0.0 }
 0x139   : > { %v1065_v63 = vsel %vm3657_vm4, %v1036_v35, %v1037_v53  ;;  %vm3142_vm12 = vcmp.ne.s32.totalorder %v415_v48, 0 }
 0x13a   : > { %v2151_v7 = vmul.f32 -1.442695, %v3038_v56  ;;  %v1101_v8 = vsel %vm3033_vm6, %v1065_v63, 0.0  ;;  %v3053_v9 = vpop.f32.mrf.mxu0  ;;  %v889_v10 = vpop.f32.mrf.mxu1 }
 0x13b   : > { %v1133_v61 = vadd.f32 %v1117_v60, %v1101_v8  ;;  %v1038_v12 = vrot.slane %v889_v10, 1  ;;  %v366_v8 = vand.u32 15, %v316_v37  ;;  %v1120_v10 = vadd.f32 %v1023_v47, %v2997_v26 }
 0x13c   : > { %2399 = vpow2.f32 %v2151_v7  ;;  %v3057_v17 = vpop.f32.mrf.mxu0  ;;  %v3059_v11 = vpop.f32.mrf.mxu1  ;;  %v961_v37 = vrot.slane %v3053_v9, 7 }
 0x13d   : > { %v3066_v19 = vadd.f32 %v3020_v42, %v1133_v61  ;;  %v1064_v21 = vsel %vm3657_vm4, %v1037_v53, %v1038_v12  ;;  %v959_v53 = vrot.slane %v3004_v32, 7  ;;  %vm3129_vm11 = vcmp.ne.s32.totalorder %v366_v8, 15 }
 0x13e   : > { %v1134_v25 = vadd.f32 %v1118_v13, %v1064_v21  ;;  %v3074_v28 = vpop.f32.mrf.mxu0  ;;  %v895_v31 = vpop.f32.mrf.mxu1 }
 0x13f   : > { %v2152_v33 = vmul.f32 -1.442695, %v3066_v19  ;;  %v1039_v35 = vrot.slane %v895_v31, 1  ;;  %v981_v21 = vsel %vm3654_vm1, %v958_v4, %v959_v53  ;;  %v980_v26 = vsel %vm3654_vm1, %v959_v53, %v960_v54 }
 0x140   : > { %v3084_v30 = vadd.f32 %v3020_v42, %v1134_v25  ;;  %v3086_v41 = vpop.f32.mrf.mxu0  ;;  %v3088_v43 = vpop.f32.mrf.mxu1  ;;  %v318_v31 = vadd.s32 56, %v2947_v50  ;;  %v962_v38 = vrot.slane %v3074_v28, 7 }
 0x141   : > { %2401 = vpow2.f32 %v2152_v33  ;;  %v1063_v49 = vsel %vm3657_vm4, %v1038_v12, %v1039_v35 }
 0x142   : > { %v2153_v60 = vmul.f32 -1.442695, %v3084_v30  ;;  %v1103_v62 = vsel %vm3076_vm8, %v1063_v49, 0.0  ;;  %v3101_v63 = vpop.f32.mrf.mxu0  ;;  %v899_v2 = vpop.f32.mrf.mxu1  ;;  %v380_v48 = vand.u32 15, %v318_v31 }
 0x143   : > { %v1135_v16 = vadd.f32 %v1119_v46, %v1103_v62  ;;  %v1040_v7 = vrot.slane %v899_v2, 1  ;;  %v1025_v62 = vsel %vm3108_vm9, %v980_v26, 0.0 }
 0x144   : > { %2403 = vpow2.f32 %v2153_v60  ;;  %v3104_v61 = vpop.f32.mrf.mxu0  ;;  %v3106_v32 = vpop.f32.mrf.mxu1  ;;  %v1121_v60 = vadd.f32 %v981_v21, %v3009_v39  ;;  %v321_v39 = vadd.s32 80, %v2947_v50  ;;  %vm3180_vm13 = vcmp.ne.s32.totalorder %v380_v48, 15 }
 0x145   : > { %v3113_v13 = vadd.f32 %v3020_v42, %v1135_v16  ;;  %v1062_v15 = vsel %vm3657_vm4, %v1039_v35, %v1040_v7 }
 0x146   : > { %v1136_v6 = vadd.f32 %v1120_v10, %v1062_v15  ;;  %v3121_v23 = vpop.f32.mrf.mxu0  ;;  %v905_v25 = vpop.f32.mrf.mxu1 }
 0x147   : > { %v2154_v33 = vmul.f32 -1.442695, %v3113_v13  ;;  %v1041_v4 = vrot.slane %v905_v25, 1  ;;  %v978_v25 = vsel %vm3654_vm1, %v961_v37, %v962_v38 }
 0x148   : > { %v3136_v44 = vadd.f32 %v3020_v42, %v1136_v6  ;;  %v3138_v46 = vpop.f32.mrf.mxu0  ;;  %v3140_v47 = vpop.f32.mrf.mxu1  ;;  %v1122_v6 = vadd.f32 %v1025_v62, %v3040_v57 }
 0x149   : > { %v2400_v53 = vpop.eup %2399  ;;  %2405 = vpow2.f32 %v2154_v33  ;;  %v1061_v9 = vsel %vm3657_vm4, %v1040_v7, %v1041_v4  ;;  %v979_v7 = vsel %vm3654_vm1, %v960_v54, %v961_v37 }
 0x14a   : > { %v1219_v2 = vadd.f32 1.0, %v2400_v53  ;;  %v2155_v16 = vmul.f32 -1.442695, %v3136_v44  ;;  %v1105_v3 = vsel %vm3129_vm11, %v1061_v9, 0.0  ;;  %v3154_v8 = vpop.f32.mrf.mxu0  ;;  %v909_v10 = vpop.f32.mrf.mxu1 }
 0x14b   : > { %v1137_v15 = vadd.f32 %v1121_v60, %v1105_v3  ;;  %v965_v21 = vrot.slane %v3154_v8, 7  ;;  %v1042_v26 = vrot.slane %v909_v10, 1  ;;  %v1027_v10 = vsel %vm3125_vm10, %v978_v25, 0.0 }
 0x14c   : > { %2407 = vrcp.f32 %v1219_v2  ;;  %v3165_v33 = vpop.f32.mrf.mxu1 }
 0x14d   : > { %2409 = vpow2.f32 %v2155_v16  ;;  %v3168_v31 = vadd.f32 %v3020_v42, %v1137_v15  ;;  %v974_v57 = vsel %vm3654_vm1, %v965_v21, %v966_v58  ;;  %v1060_v54 = vsel %vm3657_vm4, %v1041_v4, %v1042_v26 }
 0x14e   : > { %v2402_v53 = vpop.eup %2401  ;;  %v1031_v37 = vsel %vm3142_vm12, %v974_v57, 0.0  ;;  %v1138_v60 = vadd.f32 %v1122_v6, %v1060_v54  ;;  %v915_v9 = vpop.f32.mrf.mxu1  ;;  %v1123_v4 = vadd.f32 %v979_v7, %v3057_v17  ;;  %v401_v15 = vand.u32 15, %v321_v39 }
 0x14f   : > { %v1220_v2 = vadd.f32 1.0, %v2402_v53  ;;  %v2156_v16 = vmul.f32 -1.442695, %v3168_v31  ;;  %v3187_v58 = vadd.f32 %v1031_v37, %v2952_v55  ;;  %v1043_v3 = vrot.slane %v915_v9, 1 }
 0x150   : > { %v3193_v48 = vadd.f32 %v3020_v42, %v1138_v60  ;;  %v3195_v6 = vpop.f32.mrf.mxu1  ;;  %v963_v54 = vrot.slane %v3101_v63, 7  ;;  %v964_v53 = vrot.slane %v3121_v23, 7  ;;  %v394_v9 = vand.u32 15, %v320_v52 }
 0x151   : > { %v2404_v57 = vpop.eup %2403  ;;  %2411 = vrcp.f32 %v1220_v2  ;;  %v1059_v55 = vsel %vm3657_vm4, %v1042_v26, %v1043_v3  ;;  %v1124_v2 = vadd.f32 %v1027_v10, %v3086_v41  ;;  %v322_v23 = vadd.s32 88, %v2947_v50 }
 0x152   : > { %v1221_v37 = vadd.f32 1.0, %v2404_v57  ;;  %2413 = vpow2.f32 %v2156_v16  ;;  %v2157_v17 = vmul.f32 -1.442695, %v3193_v48  ;;  %v1107_v39 = vsel %vm3180_vm13, %v1059_v55, 0.0  ;;  %v919_v7 = vpop.f32.mrf.mxu1 }
 0x153   : > { %v1139_v25 = vadd.f32 %v1123_v4, %v1107_v39  ;;  %v1044_v60 = vrot.slane %v919_v7, 1  ;;  %v977_v52 = vsel %vm3654_vm1, %v962_v38, %v963_v54  ;;  %vm3217_vm14 = vcmp.ne.s32.totalorder %v401_v15, 0 }
 0x154   : > { %2415 = vrcp.f32 %v1221_v37  ;;  %v3205_v63 = vpop.f32.mrf.mxu1  ;;  %v976_v4 = vsel %vm3654_vm1, %v963_v54, %v964_v53  ;;  %vm3224_vm15 = vcmp.ne.s32.totalorder %v394_v9, 15  ;;  %v408_v15 = vand.u32 15, %v322_v23 }
 0x155   : > { %2417 = vpow2.f32 %v2157_v17  ;;  %v3209_v26 = vadd.f32 %v3020_v42, %v1139_v25  ;;  %v1058_v16 = vsel %vm3657_vm4, %v1043_v3, %v1044_v60  ;;  %v1283_v25 = vld [vmem:[%s2818_s19] sm:$0xff]  ;;  %v1125_v54 = vadd.f32 %v977_v52, %v3104_v61 }
 0x156   : > { %v2406_v57 = vpop.eup %2405  ;;  %v1140_v10 = vadd.f32 %v1124_v2, %v1058_v16  ;;  %v925_v55 = vpop.f32.mrf.mxu1  ;;  %v1029_v2 = vsel %vm3217_vm14, %v976_v4, 0.0  ;;  %v324_v52 = vadd.s32 104, %v2947_v50  ;;  %vm3260_vm0 = vcmp.ne.s32.totalorder %v408_v15, 15 }
 0x157   : > { %v1222_v37 = vadd.f32 1.0, %v2406_v57  ;;  %v2158_v17 = vmul.f32 -1.442695, %v3209_v26  ;;  %v1045_v28 = vrot.slane %v925_v55, 1 }
 0x158   : > { %v3229_v39 = vadd.f32 %v3020_v42, %v1140_v10  ;;  %v3231_v38 = vpop.f32.mrf.mxu1 }
 0x159   : > { %v2408_v7 = vpop.eup %2407  ;;  %2419 = vrcp.f32 %v1222_v37  ;;  %v1057_v9 = vsel %vm3657_vm4, %v1044_v60, %v1045_v28  ;;  %v1126_v60 = vadd.f32 %v1029_v2, %v3138_v46  ;;  %v975_v46 = vsel %vm3654_vm1, %v964_v53, %v965_v21 }
 0x15a   : > { %v2410_v16 = vpop.eup %2409  ;;  %v1267_v57 = vmul.f32 %v2408_v7, %v3038_v56  ;;  %2421 = vpow2.f32 %v2158_v17  ;;  %v2159_v10 = vmul.f32 -1.442695, %v3229_v39  ;;  %v1109_v23 = vsel %vm3224_vm15, %v1057_v9, 0.0  ;;  %v929_v55 = vpop.f32.mrf.mxu1  ;;  %v1284_v9 = vld [vmem:[%s2818_s19 + $0x8] sm:$0xff] }
 0x15b   : > { %v1223_v37 = vadd.f32 1.0, %v2410_v16  ;;  %v1141_v0 = vadd.f32 %v1125_v54, %v1109_v23  ;;  %v1046_v61 = vrot.slane %v929_v55, 1  ;;  %v818_v16 = vpop.f32.mrf.mxu0  ;;  %v422_v55 = vand.u32 15, %v324_v52 }
 0x15c   : > { %v3244_v4 = vadd.f32 %v1283_v25, %v1267_v57  ;;  %2423 = vpow2.f32 %v2159_v10  ;;  %v3247_v34 = vpop.f32.mrf.mxu1  ;;  %v326_v53 = vadd.s32 120, %v2947_v50 }
 0x15d   : > { %2425 = vrcp.f32 %v1223_v37  ;;  %v3250_v56 = vadd.f32 %v3020_v42, %v1141_v0  ;;  %v1056_v17 = vsel %vm3657_vm4, %v1045_v28, %v1046_v61  ;;  %vm3295_vm1 = vcmp.ne.s32.totalorder %v422_v55, 15 }
 0x15e   : > { %v2412_v7 = vpop.eup %2411  ;;  %v2167_v54 = vmul.f32 -1.442695, %v3244_v4  ;;  %v1142_v25 = vadd.f32 %v1126_v60, %v1056_v17  ;;  %v935_v0 = vpop.f32.mrf.mxu1  ;;  %v1127_v17 = vadd.f32 %v975_v46, %v818_v16  ;;  %v436_v27 = vand.u32 15, %v326_v53 }
 0x15f   : > { %v2414_v57 = vpop.eup %2413  ;;  %v1268_v28 = vmul.f32 %v2412_v7, %v3066_v19  ;;  %v2160_v10 = vmul.f32 -1.442695, %v3250_v56  ;;  %v1047_v23 = vrot.slane %v935_v0, 1  ;;  %v1285_v7 = vld [vmem:[%s2818_s19 + $0x10] sm:$0xff]  ;;  %v3703_v55 = vmov 0 }
 0x160   : > { %2427 = vpow2.f32 %v2167_v54  ;;  %v1224_v37 = vadd.f32 1.0, %v2414_v57  ;;  %v3267_v8 = vadd.f32 %v3020_v42, %v1142_v25  ;;  %v3269_v21 = vpop.f32.mrf.mxu1  ;;  %vm3307_vm3 = vcmp.ne.s32.totalorder %v436_v27, 15 }
 0x161   : > { %v2416_v15 = vpop.eup %2415  ;;  %v3272_v60 = vadd.f32 %v1284_v9, %v1268_v28  ;;  %2429 = vpow2.f32 %v2160_v10  ;;  %v1055_v19 = vsel %vm3657_vm4, %v1046_v61, %v1047_v23  ;;  %v3704_v55 = vsel %vm3307_vm3, 4294967295, %v3703_v55 }
 0x162   : > { %v2418_v0 = vpop.eup %2417  ;;  %2431 = vrcp.f32 %v1224_v37  ;;  %v2161_v52 = vmul.f32 -1.442695, %v3267_v8  ;;  %v1111_v54 = vsel %vm3260_vm0, %v1055_v19, 0.0  ;;  %v939_v25 = vpop.f32.mrf.mxu1  ;;  %v1269_v57 = vmul.f32 %v2416_v15, %v3084_v30 }
 0x163   : > { %v2168_v9 = vmul.f32 -1.442695, %v3272_v60  ;;  %v1225_v28 = vadd.f32 1.0, %v2418_v0  ;;  %v1143_v10 = vadd.f32 %v1127_v17, %v1111_v54  ;;  %v1048_v16 = vrot.slane %v939_v25, 1  ;;  %v1286_v17 = vld [vmem:[%s2818_s19 + $0x18] sm:$0xff] }
 0x164   : > { %2433 = vpow2.f32 %v2161_v52  ;;  %v3282_v46 = vpop.f32.mrf.mxu1  ;;  %v3284_v61 = vadd.f32 %v1285_v7, %v1269_v57 }
 0x165   : > { %2435 = vpow2.f32 %v2168_v9  ;;  %v3287_v37 = vadd.f32 %v3020_v42, %v1143_v10  ;;  %v1054_v19 = vsel %vm3657_vm4, %v1047_v23, %v1048_v16 }
 0x166   : > { %v2420_v30 = vpop.eup %2419  ;;  %2437 = vrcp.f32 %v1225_v28  ;;  %v1144_v15 = vadd.f32 %v3187_v58, %v1054_v19  ;;  %v945_v0 = vpop.f32.mrf.mxu1  ;;  %v2169_v52 = vmul.f32 -1.442695, %v3284_v61 }
 0x167   : > { %v2422_v54 = vpop.eup %2421  ;;  %v2162_v7 = vmul.f32 -1.442695, %v3287_v37  ;;  %v1049_v57 = vrot.slane %v945_v0, 1  ;;  %v1270_v9 = vmul.f32 %v2420_v30, %v3113_v13 }
 0x168   : > { %v1226_v23 = vadd.f32 1.0, %v2422_v54  ;;  %v3301_v53 = vadd.f32 %v3020_v42, %v1144_v15  ;;  %v3303_v28 = vpop.f32.mrf.mxu1  ;;  %2439 = vpow2.f32 %v2169_v52 }
 0x169   : > { %3702 = vst [vmem:[#allocation13_spill] sm:$0xff] %v3303_v28  ;;  %v2424_v58 = vpop.eup %2423  ;;  %2441 = vpow2.f32 %v2162_v7  ;;  %v1053_v10 = vsel %vm3657_vm4, %v1048_v16, %v1049_v57  ;;  %v3311_v19 = vadd.f32 %v1286_v17, %v1270_v9  ;;  %v1287_v17 = vld [vmem:[%s2818_s19 + $0x20] sm:$0xff] }
 0x16a   : > { %v2426_v13 = vpop.eup %2425  ;;  %2443 = vrcp.f32 %v1226_v23  ;;  %v1227_v30 = vadd.f32 1.0, %v2424_v58  ;;  %v2163_v15 = vmul.f32 -1.442695, %v3301_v53  ;;  %v1113_v0 = vsel %vm3295_vm1, %v1053_v10, 0.0  ;;  %v949_v52 = vpop.f32.mrf.mxu1 }
 0x16b   : > { %v1145_v54 = vadd.f32 %v2960_v1, %v1113_v0  ;;  %v1050_v7 = vrot.slane %v949_v52, 1  ;;  %v2170_v16 = vmul.f32 -1.442695, %v3311_v19  ;;  %v1271_v27 = vmul.f32 %v2426_v13, %v3136_v44 }
 0x16c   : > { %2445 = vrcp.f32 %v1227_v30  ;;  %v3705_v10 = vrot.slane %v2994_v24, 1 }
 0x16d   : > { %v2428_v9 = vpop.eup %2427  ;;  %2447 = vpow2.f32 %v2163_v15  ;;  %v3321_v23 = vadd.f32 %v3020_v42, %v1145_v54  ;;  %v1052_v58 = vsel %vm3657_vm4, %v1049_v57, %v1050_v7  ;;  %v1288_v57 = vld [vmem:[%s2818_s19 + $0x28] sm:$0xff]  ;;  %v3335_v20 = vadd.f32 %v1287_v17, %v1271_v27 }
 0x16e   : > { %v1067_v1 = vsel %vm3657_vm4, %v1050_v7, %v3705_v10  ;;  %v2430_v0 = vpop.eup %2429  ;;  %v1363_v52 = vadd.f32 1.0, %v2428_v9  ;;  %v1146_v13 = vadd.f32 %v2977_v14, %v1052_v58  ;;  %2449 = vpow2.f32 %v2170_v16 }
 0x16f   : > { %v1115_v44 = vsel %vm3307_vm3, %v1067_v1, 0.0  ;;  %v2432_v30 = vpop.eup %2431  ;;  %v1228_v15 = vadd.f32 1.0, %v2430_v0  ;;  %v2164_v54 = vmul.f32 -1.442695, %v3321_v23  ;;  %v2171_v16 = vmul.f32 -1.442695, %v3335_v20 }
 0x170   : > { %v1147_v28 = vadd.f32 %v2990_v22, %v1115_v44  ;;  %2451 = vrcp.f32 %v1363_v52  ;;  %v3338_v24 = vadd.f32 %v3020_v42, %v1146_v13  ;;  %v1272_v7 = vmul.f32 %v2432_v30, %v3168_v31  ;;  %v1289_v31 = vld [vmem:[%s2818_s19 + $0x30] sm:$0xff] }
 0x171   : > { %v2434_v9 = vpop.eup %2433  ;;  %2453 = vrcp.f32 %v1228_v15  ;;  %vm3707_vm4 = vcmp.lt.s32.totalorder %v2947_v50, 1 }
 0x172   : > { %v3342_v14 = vadd.f32 %v3020_v42, %v1147_v28  ;;  %v2436_v58 = vpop.eup %2435  ;;  %v1229_v10 = vadd.f32 1.0, %v2434_v9  ;;  %2455 = vpow2.f32 %v2164_v54  ;;  %v2165_v22 = vmul.f32 -1.442695, %v3338_v24  ;;  %v1290_v54 = vld [vmem:[%s2818_s19 + $0x38] sm:$0xff]  ;;  %vm3708_vm3 = vmmov %vm3707_vm4 }
 0x173   : > { %v3346_v27 = vadd.f32 %v1288_v57, %v1272_v7  ;;  %v2438_v17 = vpop.eup %2437  ;;  %v1364_v1 = vadd.f32 1.0, %v2436_v58  ;;  %2457 = vpow2.f32 %v2171_v16 }
 0x174   : > { %v2166_v0 = vmul.f32 -1.442695, %v3342_v14  ;;  %2459 = vrcp.f32 %v1229_v10  ;;  %v1273_v42 = vmul.f32 %v2438_v17, %v3193_v48  ;;  %v1291_v48 = vld [vmem:[%s2818_s19 + $0x40] sm:$0xff] }
 0x175   : > { %v2440_v28 = vpop.eup %2439  ;;  %2461 = vrcp.f32 %v1364_v1  ;;  %v2172_v44 = vmul.f32 -1.442695, %v3346_v27 }
 0x176   : > { %v2442_v52 = vpop.eup %2441  ;;  %2463 = vpow2.f32 %v2165_v22  ;;  %v3352_v13 = vadd.f32 %v1289_v31, %v1273_v42  ;;  %v1365_v57 = vadd.f32 1.0, %v2440_v28 }
 0x177   : > { %v2444_v30 = vpop.eup %2443  ;;  %v1230_v15 = vadd.f32 1.0, %v2442_v52  ;;  %2465 = vpow2.f32 %v2166_v0  ;;  %v1292_v52 = vld [vmem:[%s2818_s19 + $0x48] sm:$0xff] }
 0x178   : > { %v1274_v7 = vmul.f32 %v2444_v30, %v3209_v26  ;;  %v2173_v9 = vmul.f32 -1.442695, %v3352_v13 }
 0x179   : > { %v2446_v16 = vpop.eup %2445  ;;  %2467 = vrcp.f32 %v1230_v15 }
 0x17a   : > { %v2448_v58 = vpop.eup %2447  ;;  %2469 = vpow2.f32 %v2172_v44  ;;  %v3358_v10 = vadd.f32 %v1290_v54, %v1274_v7  ;;  %v1275_v22 = vmul.f32 %v2446_v16, %v3229_v39  ;;  %v1293_v16 = vld [vmem:[%s2818_s19 + $0x50] sm:$0xff] }
 0x17b   : > { %v2450_v17 = vpop.eup %2449  ;;  %v1231_v1 = vadd.f32 1.0, %v2448_v58  ;;  %2471 = vpow2.f32 %v2173_v9 }
 0x17c   : > { %v1366_v0 = vadd.f32 1.0, %v2450_v17  ;;  %2473 = vrcp.f32 %v1365_v57  ;;  %v2174_v31 = vmul.f32 -1.442695, %v3358_v10  ;;  %v3362_v26 = vadd.f32 %v1291_v48, %v1275_v22 }
 0x17d   : > { %v2452_v42 = vpop.eup %2451  ;;  %2475 = vrcp.f32 %v1231_v1 }
 0x17e   : > { %v2454_v28 = vpop.eup %2453  ;;  %2477 = vrcp.f32 %v1366_v0  ;;  %v2175_v44 = vmul.f32 -1.442695, %v3362_v26  ;;  %v1411_v17 = vmul.f32 %v2452_v42, %v3244_v4  ;;  %v3706_v42 = vmov 0  }
 0x17f   : > { %v2456_v30 = vpop.eup %2455  ;;  %2479 = vpow2.f32 %v2174_v31  ;;  %v1276_v39 = vmul.f32 %v2454_v28, %v3250_v56 }
 0x180   : > { %v2458_v15 = vpop.eup %2457  ;;  %v1232_v54 = vadd.f32 1.0, %v2456_v30  ;;  %2481 = vpow2.f32 %v2175_v44 }
 0x181   : > { %v2460_v57 = vpop.eup %2459  ;;  %v1367_v7 = vadd.f32 1.0, %v2458_v15  ;;  %v3367_v9 = vadd.f32 %v1292_v52, %v1276_v39  ;;  %v1294_v39 = vld [vmem:[%s2818_s19 + $0x58] sm:$0xff] }
 0x182   : > { %v2462_v48 = vpop.eup %2461  ;;  %2483 = vrcp.f32 %v1232_v54  ;;  %v1277_v58 = vmul.f32 %v2460_v57, %v3267_v8 }
 0x183   : > { %v2464_v22 = vpop.eup %2463  ;;  %v1412_v1 = vmul.f32 %v2462_v48, %v3272_v60  ;;  %v2176_v56 = vmul.f32 -1.442695, %v3367_v9  ;;  %2485 = vrcp.f32 %v1367_v7 }
 0x184   : > { %v2466_v0 = vpop.eup %2465  ;;  %v1233_v31 = vadd.f32 1.0, %v2464_v22  ;;  %v3374_v28 = vadd.f32 %v1293_v16, %v1277_v58  ;;  %v1295_v58 = vld [vmem:[%s2818_s19 + $0x60] sm:$0xff] }
 0x185   : > { %v1234_v52 = vadd.f32 1.0, %v2466_v0  ;;  %v1427_v44 = vpack.c.bf16 %v1412_v1, %v1411_v17  ;;  %2487 = vpow2.f32 %v2176_v56 }
 0x186   : > { %v2468_v30 = vpop.eup %2467  ;;  %2489 = vrcp.f32 %v1233_v31  ;;  %v2177_v8 = vmul.f32 -1.442695, %v3374_v28 }
 0x187   : > { %v2470_v15 = vpop.eup %2469  ;;  %2491 = vrcp.f32 %v1234_v52  ;;  %1628 = vmatmul.mubr.bf16.vlgmr.msra.gmra.mxu0 %v1427_v44  ;;  %2247 = vmatprep.mubr.bf16.mxu1 %v1427_v44  ;;  %v1278_v4 = vmul.f32 %v2468_v30, %v3287_v37 }
 0x188   : > { %v2472_v60 = vpop.eup %2471  ;;  %1637 = vmatprep.mubr.bf16.mxu0 %v3706_v42  ;;  %v1368_v54 = vadd.f32 1.0, %v2470_v15  ;;  %2493 = vpow2.f32 %v2177_v8  ;;  %v1296_v15 = vld [vmem:[%s2818_s19 + $0x68] sm:$0xff] }
 0x189   : > { %v2474_v57 = vpop.eup %2473  ;;  %v1369_v7 = vadd.f32 1.0, %v2472_v60  ;;  %v3380_v16 = vadd.f32 %v1294_v39, %v1278_v4 }
 0x18a   : > { %v2476_v48 = vpop.eup %2475  ;;  %2495 = vrcp.f32 %v1368_v54  ;;  %v1413_v37 = vmul.f32 %v2474_v57, %v3284_v61 }
 0x18b   : > { %v2478_v22 = vpop.eup %2477  ;;  %v2178_v17 = vmul.f32 -1.442695, %v3380_v16  ;;  %v1279_v1 = vmul.f32 %v2476_v48, %v3301_v53  ;;  %2497 = vrcp.f32 %v1369_v7  ;;  %v1297_v7 = vld [vmem:[%s2818_s19 + $0x70] sm:$0xff] }
 0x18c   : > { %v2480_v56 = vpop.eup %2479  ;;  %v1414_v0 = vmul.f32 %v2478_v22, %v3311_v19 }
 0x18d   : > { %v2482_v31 = vpop.eup %2481  ;;  %v1370_v52 = vadd.f32 1.0, %v2480_v56  ;;  %2499 = vpow2.f32 %v2178_v17  ;;  %v3387_v44 = vadd.f32 %v1295_v58, %v1279_v1  ;;  %v1298_v17 = vld [vmem:[%s2818_s19 + $0x78] sm:$0xff] }
 0x18e   : > { %v1428_v30 = vpack.c.bf16 %v1414_v0, %v1413_v37  ;;  %v1371_v8 = vadd.f32 1.0, %v2482_v31 }
 0x18f   : > { %v2484_v39 = vpop.eup %2483  ;;  %2501 = vrcp.f32 %v1370_v52  ;;  %v2179_v4 = vmul.f32 -1.442695, %v3387_v44 }
 0x190   : > { %1638 = vmatmul.mubr.bf16.gmra.mxu0 %v1428_v30  ;;  %2248 = vmatmul.mubr.bf16.vlgmr.msra.gmra.mxu1 %v1428_v30  ;;  %v1280_v61 = vmul.f32 %v2484_v39, %v3321_v23  ;;  %v2486_v53 = vpop.eup %2485 }
 0x191   : > { %1647 = vmatprep.mubr.bf16.mxu0 %v3706_v42  ;;  %2503 = vpow2.f32 %v2179_v4  ;;  %v1415_v52 = vmul.f32 %v2486_v53, %v3335_v20 }
 0x192   : > { %v2488_v19 = vpop.eup %2487  ;;  %v3393_v60 = vadd.f32 %v1296_v15, %v1280_v61  ;;  %2505 = vrcp.f32 %v1371_v8 }
 0x193   : > { %v2490_v54 = vpop.eup %2489  ;;  %v1372_v57 = vadd.f32 1.0, %v2488_v19 }
 0x194   : > { %v2492_v48 = vpop.eup %2491  ;;  %v2180_v58 = vmul.f32 -1.442695, %v3393_v60  ;;  %v1281_v22 = vmul.f32 %v2490_v54, %v3338_v24 }
 0x195   : > { %v2494_v1 = vpop.eup %2493  ;;  %2507 = vrcp.f32 %v1372_v57  ;;  %v1282_v23 = vmul.f32 %v2492_v48, %v3342_v14 }
 0x196   : > { %v1373_v56 = vadd.f32 1.0, %v2494_v1  ;;  %2509 = vpow2.f32 %v2180_v58  ;;  %v1313_v37 = vadd.f32 %v1297_v7, %v1281_v22 }
 0x197   : > { %v2496_v0 = vpop.eup %2495  ;;  %v1314_v31 = vadd.f32 %v1298_v17, %v1282_v23 }
 0x198   : > { %v1416_v30 = vmul.f32 %v2496_v0, %v3346_v27  ;;  %v2181_v39 = vmul.f32 -1.442695, %v1313_v37  ;;  %v2498_v8 = vpop.eup %2497  ;;  %2511 = vrcp.f32 %v1373_v56 }
 0x199   : > { %v2182_v15 = vmul.f32 -1.442695, %v1314_v31  ;;  %v1417_v14 = vmul.f32 %v2498_v8, %v3352_v13 }
 0x19a   : > { %v2500_v4 = vpop.eup %2499  ;;  %v1429_v24 = vpack.c.bf16 %v1416_v30, %v1415_v52  ;;  %2513 = vpow2.f32 %v2181_v39 }
 0x19b   : > { %v1374_v61 = vadd.f32 1.0, %v2500_v4  ;;  %2515 = vpow2.f32 %v2182_v15 }
 0x19c   : > { %v2502_v19 = vpop.eup %2501  ;;  %1648 = vmatmul.mubr.bf16.gmra.mxu0 %v1429_v24  ;;  %2251 = vmatprep.mubr.bf16.mxu1 %v1429_v24 }
 0x19d   : > { %1657 = vmatprep.mubr.bf16.mxu0 %v3706_v42  ;;  %v1418_v20 = vmul.f32 %v2502_v19, %v3358_v10  ;;  %2517 = vrcp.f32 %v1374_v61 }
 0x19e   : > { %v2504_v27 = vpop.eup %2503 }
 0x19f   : > { %v1430_v53 = vpack.c.bf16 %v1418_v20, %v1417_v14  ;;  %v2506_v54 = vpop.eup %2505  ;;  %v1375_v57 = vadd.f32 1.0, %v2504_v27 }
 0x1a0   : > { %v1419_v58 = vmul.f32 %v2506_v54, %v3362_v26 }
 0x1a1   : > { %2252 = vmatmul.mubr.bf16.gmra.mxu1 %v1430_v53  ;;  %2519 = vrcp.f32 %v1375_v57 }
 0x1a2   : > { %v2508_v7 = vpop.eup %2507 }
 0x1a3   : > { %v2510_v48 = vpop.eup %2509  ;;  %v1420_v22 = vmul.f32 %v2508_v7, %v3367_v9 }
 0x1a4   : > { %1658 = vmatmul.mubr.bf16.gmra.mxu0 %v1430_v53  ;;  %v1376_v17 = vadd.f32 1.0, %v2510_v48  ;;  %v3419_v53 = vpop.f32.mrf.mxu1 }
 0x1a5   : > { %1667 = vmatprep.mubr.bf16.mxu0 %v3706_v42  ;;  %v1431_v13 = vpack.c.bf16 %v1420_v22, %v1419_v58  ;;  %v2512_v1 = vpop.eup %2511 }
 0x1a6   : > { %2521 = vrcp.f32 %v1376_v17  ;;  %v1421_v30 = vmul.f32 %v2512_v1, %v3374_v28 }
 0x1a7   : > { %v2514_v10 = vpop.eup %2513  ;;  %2255 = vmatprep.mubr.bf16.mxu1 %v1431_v13 }
 0x1a8   : > { %v2516_v23 = vpop.eup %2515  ;;  %v1377_v56 = vadd.f32 1.0, %v2514_v10 }
 0x1a9   : > { %v1378_v0 = vadd.f32 1.0, %v2516_v23 }
 0x1aa   : > { %v2518_v52 = vpop.eup %2517  ;;  %2523 = vrcp.f32 %v1377_v56 }
 0x1ab   : > { %v1422_v26 = vmul.f32 %v2518_v52, %v3380_v16  ;;  %2525 = vrcp.f32 %v1378_v0 }
 0x1ac   : > { %1668 = vmatmul.mubr.bf16.gmra.mxu0 %v1431_v13 }
 0x1ad   : > { %1677 = vmatprep.mubr.bf16.mxu0 %v3706_v42  ;;  %v1432_v9 = vpack.c.bf16 %v1422_v26, %v1421_v30 }
 0x1ae   : > { %v2520_v39 = vpop.eup %2519 }
 0x1af   : > { %2256 = vmatmul.mubr.bf16.gmra.mxu1 %v1432_v9  ;;  %v1423_v15 = vmul.f32 %v2520_v39, %v3387_v44  ;;  %v3440_v39 = vld [vmem:[%s3645_s5] ss:$0 sm:$0xff] }
 0x1b3   : > { %v2522_v8 = vpop.eup %2521 }
 0x1b4   : > { %1678 = vmatmul.mubr.bf16.gmra.mxu0 %v1432_v9  ;;  %v1424_v4 = vmul.f32 %v2522_v8, %v3393_v60 }
 0x1b5   : > { %1687 = vmatprep.mubr.bf16.mxu0 %v3706_v42 }
 0x1b6   : > { %v1433_v24 = vpack.c.bf16 %v1424_v4, %v1423_v15 }
 0x1b7   : > { %v2524_v61 = vpop.eup %2523 }
 0x1b8   : > { %v2526_v28 = vpop.eup %2525  ;;  %2259 = vmatprep.mubr.bf16.mxu1 %v1433_v24  ;;  %v1425_v16 = vmul.f32 %v2524_v61, %v1313_v37 }
 0x1b9   : > { %v1426_v19 = vmul.f32 %v2526_v28, %v1314_v31 }
 0x1bb   : > { %v1434_v14 = vpack.c.bf16 %v1426_v19, %v1425_v16 }
 0x1bc   : > { %1688 = vmatmul.mubr.bf16.gmra.mxu0 %v1433_v24 }
 0x1bd   : > { %2260 = vmatmul.mubr.bf16.gmra.mxu1 %v1434_v14  ;;  %1697 = vmatprep.mubr.bf16.mxu0 %v3706_v42 }
 0x1c4   : > { %1698 = vmatmul.mubr.bf16.gmra.mxu0 %v1434_v14 }
 0x247   : > { %v3415_v20 = vpop.f32.mrf.mxu0 }
 0x248   : > { %v1805_v42 = vrot.slane %v3415_v20, 7 }
 0x249   : > { %v3417_v27 = vpop.f32.mrf.mxu0 }
 0x24b   : > { %v1633_v44 = vpop.f32.mrf.mxu0 }
 0x24c   : > { %v1806_v7 = vrot.slane %v1633_v44, 7 }
 0x24d   : > { %v1635_v60 = vpop.f32.mrf.mxu0 }
 0x24e   : > { %v1835_v56 = vsel %vm3708_vm3, %v1805_v42, %v1806_v7 }
 0x24f   : > { %v1902_v9 = vadd.f32 %v1835_v56, %v1635_v60 }
 0x250   : > { %v1639_v54 = vpop.f32.mrf.mxu0  ;;  %v2249_v57 = vpop.f32.mrf.mxu1 }
 0x251   : > { %v1807_v48 = vrot.slane %v1639_v54, 7  ;;  %v1855_v1 = vrot.slane %v2249_v57, 1 }
 0x252   : > { %v1641_v37 = vpop.f32.mrf.mxu0  ;;  %v3421_v31 = vpop.f32.mrf.mxu1 }
 0x253   : > { %v1834_v58 = vsel %vm3707_vm4, %v1806_v7, %v1807_v48  ;;  %vm3709_vm4 = vcmp.lt.s32.totalorder %v2947_v50, 7 }
 0x254   : > { %v1839_v22 = vsel %vm3025_vm5, %v1834_v58, 0.0  ;;  %v1643_v17 = vpop.f32.mrf.mxu0  ;;  %v2250_v13 = vpop.f32.mrf.mxu1  ;;  %vm3710_vm3 = vmmov %vm3709_vm4  ;;  %vm3711_vm5 = vcmp.lt.s32.totalorder %v2947_v50, 1 }
 0x255   : > { %v1903_v10 = vadd.f32 %v1839_v22, %v1641_v37  ;;  %v1856_v23 = vrot.slane %v2250_v13, 1  ;;  %v1808_v19 = vrot.slane %v1643_v17, 7 }
 0x256   : > { %v3432_v0 = vpop.f32.mrf.mxu1  ;;  %v1645_v26 = vpop.f32.mrf.mxu0 }
 0x257   : > { %v1881_v52 = vsel %vm3709_vm4, %v1855_v1, %v1856_v23  ;;  %v1854_v30 = vrot.slane %v3432_v0, 1  ;;  %v1833_v54 = vsel %vm3711_vm5, %v1807_v48, %v1808_v19  ;;  %vm3713_vm4 = vmmov %vm3710_vm3 }
 0x258   : > { %v1919_v45 = vadd.f32 %v1903_v10, %v1881_v52  ;;  %v1904_v17 = vadd.f32 %v1833_v54, %v1645_v26 }
 0x259   : > { %v1882_v8 = vsel %vm3710_vm3, %v1854_v30, %v1855_v1  ;;  %vm3714_vm3 = vmmov %vm3711_vm5 }
 0x25a   : > { %v1935_v15 = vadd.f32 %v1919_v45, %v3042_v59  ;;  %v1886_v4 = vsel %vm3033_vm6, %v1882_v8, 0.0  ;;  %vm3712_vm6 = vmmov %vm3711_vm5 }
 0x25b   : > { %v1918_v24 = vadd.f32 %v1902_v9, %v1886_v4  ;;  %vm3715_vm5 = vmmov %vm3714_vm3 }
 0x25c   : > { %v1958_v61 = vadd.f32 %v3440_v39, %v1935_v15  ;;  %v1649_v28 = vpop.f32.mrf.mxu0 }
 0x25d   : > { %v1934_v16 = vadd.f32 %v1918_v24, %v3011_v40  ;;  %v1809_v59 = vrot.slane %v1649_v28, 7 }
 0x25e   : > { %1974 = vst [vmem:[%s3453_s15 + $0x10] sm:$0xff] %v1958_v61  ;;  %v1651_v14 = vpop.f32.mrf.mxu0 }
 0x25f   : > { %v1957_v44 = vadd.f32 %v3440_v39, %v1934_v16  ;;  %v1832_v40 = vsel %vm3712_vm6, %v1808_v19, %v1809_v59  ;;  %vm3717_vm6 = vmmov %vm3713_vm4 }
 0x260   : > { %v1653_v60 = vpop.f32.mrf.mxu0  ;;  %v1841_v10 = vsel %vm3061_vm7, %v1832_v40, 0.0  ;;  %vm3716_vm7 = vmmov %vm3713_vm4 }
 0x261   : > { %1973 = vst [vmem:[%s3453_s15 + $0x8] sm:$0xff] %v1957_v44  ;;  %v2253_v51 = vpop.f32.mrf.mxu1  ;;  %v1810_v7 = vrot.slane %v1653_v60, 7  ;;  %v1905_v28 = vadd.f32 %v1841_v10, %v1651_v14 }
 0x262   : > { %v1655_v57 = vpop.f32.mrf.mxu0  ;;  %v1859_v56 = vrot.slane %v2253_v51, 1 }
 0x263   : > { %v1758_v37 = vpop.f32.mrf.mxu1  ;;  %v1831_v9 = vsel %vm3714_vm3, %v1809_v59, %v1810_v7 }
 0x264   : > { %v1659_v58 = vpop.f32.mrf.mxu0  ;;  %v1857_v22 = vrot.slane %v1758_v37, 1  ;;  %v1906_v19 = vadd.f32 %v1831_v9, %v1655_v57 }
 0x265   : > { %v1811_v13 = vrot.slane %v1659_v58, 7  ;;  %v2254_v1 = vpop.f32.mrf.mxu1 }
 0x266   : > { %v1661_v52 = vpop.f32.mrf.mxu0  ;;  %v1880_v45 = vsel %vm3713_vm4, %v1856_v23, %v1857_v22  ;;  %v1860_v48 = vrot.slane %v2254_v1, 1 }
 0x267   : > { %v1830_v8 = vsel %vm3715_vm5, %v1810_v7, %v1811_v13  ;;  %v1888_v26 = vsel %vm3076_vm8, %v1880_v45, 0.0  ;;  %v1761_v15 = vpop.f32.mrf.mxu1  ;;  %vm3718_vm8 = vmmov %vm3713_vm4 }
 0x268   : > { %v1843_v18 = vsel %vm3108_vm9, %v1830_v8, 0.0  ;;  %v1920_v4 = vadd.f32 %v1904_v17, %v1888_v26  ;;  %v1663_v24 = vpop.f32.mrf.mxu0  ;;  %v1877_v61 = vsel %vm3716_vm7, %v1859_v56, %v1860_v48  ;;  %v1858_v23 = vrot.slane %v1761_v15, 1  ;;  %vm3719_vm9 = vmmov %vm3714_vm3 }
 0x269   : > { %v1907_v16 = vadd.f32 %v1843_v18, %v1661_v52  ;;  %v1812_v14 = vrot.slane %v1663_v24, 7  ;;  %vm3721_vm4 = vmmov %vm3714_vm3 }
 0x26a   : > { %v1936_v44 = vadd.f32 %v1920_v4, %v3059_v11  ;;  %v1665_v59 = vpop.f32.mrf.mxu0  ;;  %v1878_v29 = vsel %vm3717_vm6, %v1858_v23, %v1859_v56  ;;  %v1879_v12 = vsel %vm3718_vm8, %v1857_v22, %v1858_v23  ;;  %vm3730_vm8 = vmmov %vm3721_vm4 }
 0x26b   : > { %v1923_v60 = vadd.f32 %v1907_v16, %v1877_v61  ;;  %v1890_v51 = vsel %vm3129_vm11, %v1878_v29, 0.0  ;;  %v1921_v54 = vadd.f32 %v1905_v28, %v1879_v12  ;;  %v1829_v56 = vsel %vm3719_vm9, %v1811_v13, %v1812_v14  ;;  %vm3720_vm11 = vmmov %vm3714_vm3 }
 0x26c   : > { %v1959_v40 = vadd.f32 %v3440_v39, %v1936_v44  ;;  %v1922_v57 = vadd.f32 %v1906_v19, %v1890_v51  ;;  %v1669_v7 = vpop.f32.mrf.mxu0  ;;  %v1908_v26 = vadd.f32 %v1829_v56, %v1665_v59  ;;  %vm3722_vm3 = vmmov %vm3717_vm6 }
 0x26d   : > { %v1939_v11 = vadd.f32 %v1923_v60, %v3140_v47  ;;  %v1937_v37 = vadd.f32 %v1921_v54, %v3088_v43  ;;  %v1813_v58 = vrot.slane %v1669_v7, 7  ;;  %vm3724_vm5 = vmmov %vm3722_vm3 }
 0x26e   : > { %1975 = vst [vmem:[%s3453_s15 + $0x18] sm:$0xff] %v1959_v40  ;;  %v1938_v22 = vadd.f32 %v1922_v57, %v3106_v32  ;;  %v1671_v17 = vpop.f32.mrf.mxu0  ;;  %vm3726_vm7 = vmmov %vm3722_vm3 }
 0x26f   : > { %v1962_v35 = vadd.f32 %v3440_v39, %v1939_v11  ;;  %v1960_v1 = vadd.f32 %v3440_v39, %v1937_v37  ;;  %v2257_v10 = vpop.f32.mrf.mxu1  ;;  %v1828_v43 = vsel %vm3720_vm11, %v1812_v14, %v1813_v58  ;;  %vm3729_vm6 = vmmov %vm3722_vm3 }
 0x270   : > { %v1961_v52 = vadd.f32 %v3440_v39, %v1938_v22  ;;  %v1673_v45 = vpop.f32.mrf.mxu0  ;;  %v1845_v18 = vsel %vm3125_vm10, %v1828_v43, 0.0  ;;  %v1863_v28 = vrot.slane %v2257_v10, 1  ;;  %vm3723_vm10 = vmmov %vm3721_vm4 }
 0x271   : > { %1978 = vst [vmem:[%s3453_s15 + $0x30] sm:$0xff] %v1962_v35  ;;  %1976 = vst [vmem:[%s3453_s15 + $0x20] sm:$0xff] %v1960_v1  ;;  %v1814_v47 = vrot.slane %v1673_v45, 7  ;;  %v1774_v9 = vpop.f32.mrf.mxu1  ;;  %v1909_v12 = vadd.f32 %v1845_v18, %v1671_v17 }
 0x272   : > { %1977 = vst [vmem:[%s3453_s15 + $0x28] sm:$0xff] %v1961_v52  ;;  %v1675_v32 = vpop.f32.mrf.mxu0  ;;  %v1861_v8 = vrot.slane %v1774_v9, 1  ;;  %vm3732_vm9 = vmmov %vm3722_vm3 }
 0x273   : > { %v2258_v15 = vpop.f32.mrf.mxu1  ;;  %v1827_v13 = vsel %vm3721_vm4, %v1813_v58, %v1814_v47  ;;  %vm3734_vm11 = vmmov %vm3722_vm3 }
 0x274   : > { %v1679_v4 = vpop.f32.mrf.mxu0  ;;  %v1876_v24 = vsel %vm3722_vm3, %v1860_v48, %v1861_v8  ;;  %v1864_v61 = vrot.slane %v2258_v15, 1  ;;  %v1910_v36 = vadd.f32 %v1827_v13, %v1675_v32 }
 0x275   : > { %v1815_v23 = vrot.slane %v1679_v4, 7  ;;  %v1892_v16 = vsel %vm3180_vm13, %v1876_v24, 0.0  ;;  %v1777_v19 = vpop.f32.mrf.mxu1  ;;  %vm3725_vm13 = vmmov %vm3722_vm3 }
 0x276   : > { %v1681_v44 = vpop.f32.mrf.mxu0  ;;  %v1924_v59 = vadd.f32 %v1908_v26, %v1892_v16  ;;  %v1862_v29 = vrot.slane %v1777_v19, 1  ;;  %v1873_v51 = vsel %vm3724_vm5, %v1863_v28, %v1864_v61 }
 0x277   : > { %v1826_v60 = vsel %vm3723_vm10, %v1814_v47, %v1815_v23  ;;  %vm3741_vm10 = vnez %v3704_v55  ;;  %v3743_v55 = vld [vmem:[#allocation12_spill] sm:$0xff] }
 0x278   : > { %v1847_v48 = vsel %vm3217_vm14, %v1826_v60, 0.0  ;;  %v1940_v54 = vadd.f32 %v1924_v59, %v3165_v33  ;;  %v1683_v62 = vpop.f32.mrf.mxu0  ;;  %v1874_v40 = vsel %vm3725_vm13, %v1862_v29, %v1863_v28  ;;  %v1875_v14 = vsel %vm3726_vm7, %v1861_v8, %v1862_v29  ;;  %vm3727_vm14 = vmmov %vm3721_vm4 }
 0x279   : > { %v1911_v57 = vadd.f32 %v1847_v48, %v1681_v44  ;;  %v1894_v7 = vsel %vm3224_vm15, %v1874_v40, 0.0  ;;  %v1925_v11 = vadd.f32 %v1909_v12, %v1875_v14  ;;  %v1816_v22 = vrot.slane %v1683_v62, 7  ;;  %vm3728_vm15 = vmmov %vm3721_vm4 }
 0x27a   : > { %v1963_v37 = vadd.f32 %v3440_v39, %v1940_v54  ;;  %v1685_v58 = vpop.f32.mrf.mxu0  ;;  %v1926_v41 = vadd.f32 %v1910_v36, %v1894_v7  ;;  %v1853_v40 = vrot.slane %v3421_v31, 1 }
 0x27b   : > { %v1927_v17 = vadd.f32 %v1911_v57, %v1873_v51  ;;  %v1941_v33 = vadd.f32 %v1925_v11, %v3195_v6  ;;  %v1825_v9 = vsel %vm3727_vm14, %v1815_v23, %v1816_v22 }
 0x27c   : > { %1979 = vst [vmem:[%s3453_s15 + $0x38] sm:$0xff] %v1963_v37  ;;  %v1942_v35 = vadd.f32 %v1926_v41, %v3205_v63  ;;  %v1689_v1 = vpop.f32.mrf.mxu0  ;;  %v1912_v15 = vadd.f32 %v1825_v9, %v1685_v58 }
 0x27d   : > { %v1943_v10 = vadd.f32 %v1927_v17, %v3231_v38  ;;  %v1964_v3 = vadd.f32 %v3440_v39, %v1941_v33  ;;  %v1817_v56 = vrot.slane %v1689_v1, 7  ;;  %v2261_v52 = vpop.f32.mrf.mxu1 }
 0x27e   : > { %v1965_v45 = vadd.f32 %v3440_v39, %v1942_v35  ;;  %v1691_v43 = vpop.f32.mrf.mxu0  ;;  %v1867_v16 = vrot.slane %v2261_v52, 1  ;;  %v3738_v35 = vld [vmem:[#allocation11_spill] sm:$0xff] }
 0x27f   : > { %v1966_v47 = vadd.f32 %v3440_v39, %v1943_v10  ;;  %1980 = vst [vmem:[%s3453_s15 + $0x40] sm:$0xff] %v1964_v3  ;;  %v1824_v6 = vsel %vm3728_vm15, %v1816_v22, %v1817_v56  ;;  %v1790_v63 = vpop.f32.mrf.mxu1  ;;  %v3740_v3 = vld [vmem:[#allocation13_spill] sm:$0xff] }
 0x280   : > { %1981 = vst [vmem:[%s3453_s15 + $0x48] sm:$0xff] %v1965_v45  ;;  %v1693_v32 = vpop.f32.mrf.mxu0  ;;  %v1865_v38 = vrot.slane %v1790_v63, 1  ;;  %v1849_v18 = vsel %vm3142_vm12, %v1824_v6, 0.0  ;;  %vm3731_vm12 = vmmov %vm3722_vm3 }
 0x281   : > { %1982 = vst [vmem:[%s3453_s15 + $0x50] sm:$0xff] %v1966_v47  ;;  %v1818_v8 = vrot.slane %v1693_v32, 7  ;;  %v2262_v26 = vpop.f32.mrf.mxu1  ;;  %v1913_v29 = vadd.f32 %v1849_v18, %v1691_v43 }
 0x282   : > { %v1695_v13 = vpop.f32.mrf.mxu0  ;;  %v1872_v4 = vsel %vm3729_vm6, %v1864_v61, %v1865_v38  ;;  %v1868_v36 = vrot.slane %v2262_v26, 1 }
 0x283   : > { %v1823_v24 = vsel %vm3730_vm8, %v1817_v56, %v1818_v8  ;;  %v1896_v23 = vsel %vm3260_vm0, %v1872_v4, 0.0  ;;  %v1793_v28 = vpop.f32.mrf.mxu1  ;;  %vm3733_vm0 = vmmov %vm3721_vm4 }
 0x284   : > { %v1928_v19 = vadd.f32 %v1912_v15, %v1896_v23  ;;  %v1699_v44 = vpop.f32.mrf.mxu0  ;;  %v1866_v59 = vrot.slane %v1793_v28, 1  ;;  %v1914_v49 = vadd.f32 %v1823_v24, %v1695_v13  ;;  %v1869_v25 = vsel %vm3734_vm11, %v1867_v16, %v1868_v36  ;;  %vm3737_vm4 = vmmov %vm3733_vm0 }
 0x285   : > { %v1819_v12 = vrot.slane %v1699_v44, 7 }
 0x286   : > { %v1944_v60 = vadd.f32 %v1928_v19, %v3247_v34  ;;  %v1701_v51 = vpop.f32.mrf.mxu0  ;;  %v1870_v61 = vsel %vm3731_vm12, %v1866_v59, %v1867_v16  ;;  %v1871_v2 = vsel %vm3732_vm9, %v1865_v38, %v1866_v59 }
 0x287   : > { %v1822_v48 = vsel %vm3733_vm0, %v1818_v8, %v1819_v12  ;;  %v1898_v54 = vsel %vm3295_vm1, %v1870_v61, 0.0  ;;  %v1929_v62 = vadd.f32 %v1913_v29, %v1871_v2  ;;  %vm3735_vm1 = vmmov %vm3722_vm3  ;;  %vm3739_vm3 = vnez %v3738_v35 }
 0x288   : > { %v1967_v14 = vadd.f32 %v3440_v39, %v1944_v60  ;;  %v1851_v34 = vsel %vm2964_vm2, %v1822_v48, 0.0  ;;  %v1930_v57 = vadd.f32 %v1914_v49, %v1898_v54  ;;  %v1703_v7 = vpop.f32.mrf.mxu0  ;;  %v1884_v22 = vsel %vm3735_vm1, %v1868_v36, %v1853_v40  ;;  %vm3736_vm2 = vmmov %vm3733_vm0 }
 0x289   : > { %v1915_v11 = vadd.f32 %v1851_v34, %v1701_v51  ;;  %v1945_v37 = vadd.f32 %v1929_v62, %v3269_v21  ;;  %v1820_v58 = vrot.slane %v1703_v7, 7  ;;  %v1900_v20 = vsel %vm3741_vm10, %v1884_v22, 0.0  ;;  %vm3742_vm5 = vmmov %vm3735_vm1 }
 0x28a   : > { %1983 = vst [vmem:[%s3453_s15 + $0x58] sm:$0xff] %v1967_v14  ;;  %v1946_v41 = vadd.f32 %v1930_v57, %v3282_v46  ;;  %v1705_v31 = vpop.f32.mrf.mxu0 }
 0x28b   : > { %v1931_v5 = vadd.f32 %v1915_v11, %v1869_v25  ;;  %v1968_v17 = vadd.f32 %v3440_v39, %v1945_v37  ;;  %v1836_v21 = vsel %vm3736_vm2, %v1820_v58, %v1805_v42  ;;  %v1821_v33 = vsel %vm3737_vm4, %v1819_v12, %v1820_v58 }
 0x28c   : > { %v1969_v46 = vadd.f32 %v3440_v39, %v1946_v41  ;;  %v1837_v1 = vsel %vm3739_vm3, %v1836_v21, 0.0  ;;  %v1916_v10 = vadd.f32 %v1821_v33, %v1705_v31  ;;  %v1883_v42 = vsel %vm3742_vm5, %v1853_v40, %v1854_v30 }
 0x28d   : > { %v1947_v56 = vadd.f32 %v1931_v5, %v3740_v3  ;;  %1984 = vst [vmem:[%s3453_s15 + $0x60] sm:$0xff] %v1968_v17  ;;  %v1901_v52 = vadd.f32 %v1837_v1, %v3417_v27 }
 0x28e   : > { %1985 = vst [vmem:[%s3453_s15 + $0x68] sm:$0xff] %v1969_v46  ;;  %v1932_v45 = vadd.f32 %v1916_v10, %v1900_v20 }
 0x28f   : > { %v1970_v43 = vadd.f32 %v3440_v39, %v1947_v56  ;;  %v1917_v47 = vadd.f32 %v1901_v52, %v1883_v42 }
 0x290   : > { %v1948_v27 = vadd.f32 %v1932_v45, %v3419_v53 }
 0x291   : > { %1986 = vst [vmem:[%s3453_s15 + $0x70] sm:$0xff] %v1970_v43  ;;  %v1933_v9 = vadd.f32 %v1917_v47, %v3743_v55 }
 0x292   : > { %v1971_v0 = vadd.f32 %v3440_v39, %v1948_v27 }
 0x293   : > { %v1956_v50 = vadd.f32 %v3440_v39, %v1933_v9 }
 0x294   : > { %1987 = vst [vmem:[%s3453_s15 + $0x78] sm:$0xff] %v1971_v0 }
 0x295   : > { %1972 = vst [vmem:[%s3453_s15] sm:$0xff] %v1956_v50 }
 0x296   : > { %2594 = shalt.err (!%p2591_p5)
}
 0x297   : > { %s2595_s13 = scalar_lea.hbm %s3592_s29, 2048  ;;  %s2599_s7 = scalar_lea.hbm %s3646_s6, 4096 }
 0x298   : > { %p2596_p9 = scmp.ne.s32.totalorder %s3592_s29, %s2595_s13  ;;  %p2600_p6 = scmp.lt.s32.totalorder %s3592_s29, %s3646_s6 }
 0x299   : > { %p2601_p8 = scmp.lt.s32.totalorder %s2599_s7, %s2595_s13 }
 0x29a   : > { %p2597_p1 = pnand %p2596_p9, %p3744_p7 }
 0x29b   : > { %p2602_p3 = por %p2601_p8, %p2600_p6 }
 0x29c   : > { %p2598_p4 = pneg %p2597_p1 }
 0x29e   : > { %p2603_p11 = pnand %p2602_p3, %p2598_p4 }
 0x2a0   : > { %2606 = shalt.err (!%p2603_p11)
}
 0x2a1   : > { %s2659_s16 = smov 128   ;;  %s2660_s30 = smov 8  }
 0x2a2   : > { %2277 = dma.vmem_to_hbm [thread:$0]  (%p3744_p7), %s3594_s14, 2048, %s3592_s29, %s1989_s25, %s2659_s16, %s2659_s16, %s2660_s30  }
 0x2a3 PF: > { %s2017_s12 = sand.u32 1, %s2637_s21   ;;  %p3745_p12 = scmp.ne.s32.totalorder %s3660_s28, 0 }
 0x2a4   : > { %p3746_p10 = scmp.ge.s32.totalorder %s2649_s24, 2  ;;  %s2018_s27 = scalar_lea.sflag [#allocation4], %s2017_s12 }
 0x2a6   : > { %p2288_p2 = pnand %p3746_p10, %p3745_p12 }
 0x2a8   : > { %p2289_p13 = pneg %p2288_p2 }
 0x2aa   : > { %2632 = dma.done.wait (%p2289_p13), %s2018_s27, 2048  }
 0x2ab   : > { %2634 = vsyncadd (%p2289_p13), %s2018_s27, 4294965248  ;;  %p20_p0 = scmp.ge.s32.totalorder %s2750_s9, 4   ;;  %s3747_s21 = smov %s2641_s22 }
 0x2ac   : > { %s3748_s22 = smov %s2645_s23  ;;  %s3749_s23 = smov %s2767_s17 }
 0x2ad   : > { %s3750_s24 = smov %s2750_s9  ;;  %22 = sbr.rel (!%p20_p0) target bundleno = 6 (0x6), region = 96 }
 0x2b2   :  { %2023 = vsyncpa [#allocation3], 1 }
 0x2b3   :  { %2025 = vsyncpa [#allocation3 + $0x1], 1 }
 0x2b4   :  { %2026 = vsyncpa [#allocation6], 1 }
 0x2b5   :  { %2027 = vsyncpa [#allocation4], 1 }
 0x2b6   :  { %2029 = vsyncpa [#allocation4 + $0x1], 1 }

</bundles_post_ra>
